<compile_context>
chip_gen: v7x
topology: tpu7x:2x2x1
jax: 0.10.0
libtpu: 0.0.40
codegen_flags: <defaults>
</compile_context>

<pallas_src>
import math
from functools import partial

import jax
import jax.numpy as jnp
import numpy as np
from jax.experimental import pallas as pl
from jax.experimental.pallas import tpu as pltpu


def make_msa_kernel(S, C, num_heads):
    assert C % num_heads == 0
    NH = num_heads
    HD = C // NH
    eps = 1e-5  # nn.LayerNorm default

    def kernel(x_ref, wqkv_ref, bqkv_ref, wo_ref, bo_ref, o_ref):
        x = x_ref[0]                                           # (C, S): tokens on lanes

        # ---- LayerNorm over channels (sublane axis); gamma/beta folded into wqkv/bqkv ----
        mean = jnp.mean(x, axis=0, keepdims=True)              # (1, S)
        xc = x - mean
        var = jnp.mean(xc * xc, axis=0, keepdims=True)         # (1, S)
        xhat = xc * jax.lax.rsqrt(var + eps)                   # (C, S)

        # ---- fused QKV projection: one MXU matmul, contraction depth C ----
        qkv = jnp.dot(wqkv_ref[...], xhat,
                      preferred_element_type=jnp.float32) + bqkv_ref[...]   # (3C, S)
        q = qkv[0:C].reshape(NH, HD, S)                        # 1/sqrt(HD) already folded in
        k = qkv[C:2 * C].reshape(NH, HD, S)
        v = qkv[2 * C:3 * C].reshape(NH, HD, S)

        # ---- head-batched attention (tokens stay on the lane axis) ----
        # scores[h, qi, ki] = sum_d q[h, d, qi] * k[h, d, ki]
        s = jax.lax.dot_general(q, k, (((1,), (1,)), ((0,), (0,))),
                                preferred_element_type=jnp.float32)         # (NH, S, S)
        m = jnp.max(s, axis=-1, keepdims=True)
        p = jnp.exp(s - m)
        denom = jnp.sum(p, axis=-1, keepdims=True)
        p = p * (1.0 / denom)                                  # exact: one div per row

        # ctx[h, d, qi] = sum_k v[h, d, k] * p[h, qi, k]   (contraction depth S)
        ctx = jax.lax.dot_general(v, p, (((2,), (2,)), ((0,), (0,))),
                                  preferred_element_type=jnp.float32)       # (NH, HD, S)
        ctx_cs = ctx.reshape(C, S)                             # head-major rows == concat(heads)^T

        # ---- output projection: one MXU matmul (C,C)@(C,S); result already in (C,S) ----
        y = jnp.dot(wo_ref[...], ctx_cs,
                    preferred_element_type=jnp.float32) + bo_ref[...]       # (C, S)
        o_ref[0] = y.astype(o_ref.dtype)

    return kernel


@partial(jax.jit, static_argnums=(2,))
def msa_forward(x, params, num_heads):
    """x: (B, C, H, W) float32 -> (B, C, H, W) float32."""
    ln_w, ln_b, w_in, b_in, w_out, b_out = params
    B, C, H, W = x.shape
    S = H * W
    NH = num_heads
    HD = C // NH
    scale = 1.0 / math.sqrt(HD)

    x_cs = x.reshape(B, C, S)                                  # free (contiguous merge)

    # ---- one-time parameter repacking (plain XLA ops, outside the kernel) ----
    gamma = ln_w.reshape(C)
    beta = ln_b.reshape(C)
    bias_in = b_in.reshape(3 * C)

    # Fold LayerNorm affine:  W' = W_in * gamma (per input channel),  b' = W_in @ beta + b_in.
    wqkv = w_in * gamma[None, :]                               # (3C, C)
    bqkv = w_in @ beta + bias_in                               # (3C,)
    # Fold 1/sqrt(head_dim) into the Q block (rows 0:C of both W' and b').
    row_scale = jnp.concatenate(
        [jnp.full((C,), scale, jnp.float32), jnp.ones((2 * C,), jnp.float32)])
    wqkv = wqkv * row_scale[:, None]
    bqkv = (bqkv * row_scale).reshape(3 * C, 1)

    wo = w_out                                                 # (C, C): left operand of W_out @ ctx^T
    bo = b_out.reshape(C, 1)

    kernel = make_msa_kernel(S, C, NH)

    def const_spec(shape):
        zeros = (0,) * len(shape)
        return pl.BlockSpec(shape, lambda b: zeros)

    y_cs = pl.pallas_call(
        kernel,
        out_shape=jax.ShapeDtypeStruct((B, C, S), jnp.float32),
        grid_spec=pltpu.PrefetchScalarGridSpec(
            num_scalar_prefetch=0,
            grid=(B,),
            in_specs=[
                pl.BlockSpec((1, C, S), lambda b: (b, 0, 0)),  # tokens for this batch element
                const_spec((3 * C, C)),                        # fused QKV weight (LN + scale folded)
                const_spec((3 * C, 1)),                        # fused QKV bias
                const_spec((C, C)),                            # out_proj weight
                const_spec((C, 1)),                            # out_proj bias
            ],
            out_specs=pl.BlockSpec((1, C, S), lambda b: (b, 0, 0)),
        ),
        compiler_params=pltpu.CompilerParams(
            dimension_semantics=("parallel",)),
    )(x_cs, wqkv, bqkv, wo, bo)

    return y_cs.reshape(B, C, H, W)


def msa_reference(x, params, num_heads):
    """Pure-JAX reference mirroring the PyTorch module semantics."""
    ln_w, ln_b, w_in, b_in, w_out, b_out = params
    B, C, H, W = x.shape
    S = H * W
    hd = C // num_heads
    xs = jnp.transpose(x.reshape(B, C, S), (0, 2, 1))            # (B, S, C)

    mean = xs.mean(-1, keepdims=True)
    var = ((xs - mean) ** 2).mean(-1, keepdims=True)
    xn = (xs - mean) / jnp.sqrt(var + 1e-5) * ln_w + ln_b

    qkv = xn @ w_in.T + b_in                                     # (B, S, 3C)
    q, k, v = jnp.split(qkv, 3, axis=-1)

    def heads(t):
        return t.reshape(B, S, num_heads, hd).transpose(0, 2, 1, 3)

    q, k, v = heads(q), heads(k), heads(v)
    scores = jnp.einsum('bhqd,bhkd->bhqk', q, k) / math.sqrt(hd)
    p = jax.nn.softmax(scores, axis=-1)
    o = jnp.einsum('bhqk,bhkd->bhqd', p, v)
    o = o.transpose(0, 2, 1, 3).reshape(B, S, C)
    y = o @ w_out.T + b_out
    return jnp.transpose(y, (0, 2, 1)).reshape(B, C, H, W)


if __name__ == "__main__":
    # Small shapes consistent with the module: dim (=C) = 32, num_heads = 8, spatial 8x8.
    B, C, H, W = 2, 32, 8, 8
    num_heads = 8

    key = jax.random.PRNGKey(0)
    kx, k1, k2, k3, k4, k5, k6 = jax.random.split(key, 7)

    x = jax.random.normal(kx, (B, C, H, W), dtype=jnp.float32)

    # Deterministic synthetic parameters (shapes match nn.LayerNorm(dim) + nn.MultiheadAttention).
    ln_w = (1.0 + 0.1 * jax.random.normal(k1, (1, C))).astype(jnp.float32)
    ln_b = (0.1 * jax.random.normal(k2, (1, C))).astype(jnp.float32)
    w_in = (0.1 * jax.random.normal(k3, (3 * C, C))).astype(jnp.float32)   # in_proj_weight
    b_in = (0.05 * jax.random.normal(k4, (1, 3 * C))).astype(jnp.float32)  # in_proj_bias
    w_out = (0.1 * jax.random.normal(k5, (C, C))).astype(jnp.float32)      # out_proj.weight
    b_out = (0.05 * jax.random.normal(k6, (1, C))).astype(jnp.float32)     # out_proj.bias
    params = (ln_w, ln_b, w_in, b_in, w_out, b_out)

    y = msa_forward(x, params, num_heads)
    y = jax.block_until_ready(y)

    y_ref = msa_reference(x, params, num_heads)
    np.testing.assert_allclose(np.asarray(y), np.asarray(y_ref), rtol=2e-4, atol=2e-5)

    print("KERNEL_OK")
</pallas_src>

<mosaic_0001>
module attributes {stable_mosaic.version = 11 : i64} {
  func.func @kernel(%arg0: i32, %arg1: memref<1x32x64xf32, #tpu.memory_space<vmem>>, %arg2: memref<96x32xf32, #tpu.memory_space<vmem>>, %arg3: memref<96x1xf32, #tpu.memory_space<vmem>>, %arg4: memref<32x32xf32, #tpu.memory_space<vmem>>, %arg5: memref<32x1xf32, #tpu.memory_space<vmem>>, %arg6: memref<1x32x64xf32, #tpu.memory_space<vmem>>) attributes {dimension_semantics = [#tpu.dimension_semantics<parallel>], iteration_bounds = array<i64: 2>, scalar_prefetch = 0 : i64, scratch_operands = 0 : i64, tpu.core_type = #tpu.core_type<tc>, window_params = [{transform_indices = @transform_0, window_bounds = array<i64: 1, 32, 64>}, {pipeline_mode = #tpu.pipeline_mode<synchronous>, transform_indices = @transform_1, window_bounds = array<i64: 96, 32>}, {pipeline_mode = #tpu.pipeline_mode<synchronous>, transform_indices = @transform_2, window_bounds = array<i64: 96, 1>}, {pipeline_mode = #tpu.pipeline_mode<synchronous>, transform_indices = @transform_3, window_bounds = array<i64: 32, 32>}, {pipeline_mode = #tpu.pipeline_mode<synchronous>, transform_indices = @transform_4, window_bounds = array<i64: 32, 1>}, {transform_indices = @transform_5, window_bounds = array<i64: 1, 32, 64>}]} {
    %c0 = arith.constant 0 : index
    %c0_0 = arith.constant 0 : index
    %c0_1 = arith.constant 0 : index
    %0 = vector.load %arg1[%c0, %c0_0, %c0_1] : memref<1x32x64xf32, #tpu.memory_space<vmem>>, vector<1x32x64xf32>
    %1 = vector.shape_cast %0 : vector<1x32x64xf32> to vector<32x64xf32>
    %cst = arith.constant dense<0.000000e+00> : vector<64xf32>
    %2 = vector.multi_reduction <add>, %1, %cst [0] : vector<32x64xf32> to vector<64xf32>
    %3 = vector.shape_cast %2 : vector<64xf32> to vector<1x64xf32>
    %cst_2 = arith.constant 3.200000e+01 : f32
    %4 = vector.broadcast %cst_2 : f32 to vector<1x64xf32>
    %5 = arith.divf %3, %4 : vector<1x64xf32>
    %6 = vector.broadcast %5 : vector<1x64xf32> to vector<32x64xf32>
    %7 = arith.subf %1, %6 : vector<32x64xf32>
    %8 = arith.mulf %7, %7 : vector<32x64xf32>
    %cst_3 = arith.constant dense<0.000000e+00> : vector<64xf32>
    %9 = vector.multi_reduction <add>, %8, %cst_3 [0] : vector<32x64xf32> to vector<64xf32>
    %10 = vector.shape_cast %9 : vector<64xf32> to vector<1x64xf32>
    %cst_4 = arith.constant 3.200000e+01 : f32
    %11 = vector.broadcast %cst_4 : f32 to vector<1x64xf32>
    %12 = arith.divf %10, %11 : vector<1x64xf32>
    %cst_5 = arith.constant 9.99999974E-6 : f32
    %13 = vector.broadcast %cst_5 : f32 to vector<1x64xf32>
    %14 = arith.addf %12, %13 : vector<1x64xf32>
    %15 = math.rsqrt %14 : vector<1x64xf32>
    %16 = vector.broadcast %15 : vector<1x64xf32> to vector<32x64xf32>
    %17 = arith.mulf %7, %16 : vector<32x64xf32>
    %c0_6 = arith.constant 0 : index
    %c0_7 = arith.constant 0 : index
    %18 = vector.load %arg2[%c0_6, %c0_7] : memref<96x32xf32, #tpu.memory_space<vmem>>, vector<96x32xf32>
    %cst_8 = arith.constant dense<0.000000e+00> : vector<96x64xf32>
    %19 = tpu.matmul %18, %17, %cst_8 {dimension_numbers = #tpu.dot_dimension_numbers<[1], [0], [0], [1], [0, 0, 1, 1], [], []>} : vector<96x32xf32>, vector<32x64xf32>, vector<96x64xf32> -> vector<96x64xf32>
    %c0_9 = arith.constant 0 : index
    %c0_10 = arith.constant 0 : index
    %20 = vector.load %arg3[%c0_9, %c0_10] : memref<96x1xf32, #tpu.memory_space<vmem>>, vector<96x1xf32>
    %21 = vector.broadcast %20 : vector<96x1xf32> to vector<96x64xf32>
    %22 = arith.addf %19, %21 : vector<96x64xf32>
    %23 = vector.extract_strided_slice %22 {offsets = [0, 0], sizes = [32, 64], strides = [1, 1]} : vector<96x64xf32> to vector<32x64xf32>
    %24 = vector.shape_cast %23 : vector<32x64xf32> to vector<8x4x64xf32>
    %25 = vector.extract_strided_slice %22 {offsets = [32, 0], sizes = [32, 64], strides = [1, 1]} : vector<96x64xf32> to vector<32x64xf32>
    %26 = vector.shape_cast %25 : vector<32x64xf32> to vector<8x4x64xf32>
    %27 = vector.extract_strided_slice %22 {offsets = [64, 0], sizes = [32, 64], strides = [1, 1]} : vector<96x64xf32> to vector<32x64xf32>
    %28 = vector.shape_cast %27 : vector<32x64xf32> to vector<8x4x64xf32>
    %cst_11 = arith.constant dense<0.000000e+00> : vector<8x64x64xf32>
    %29 = tpu.matmul %24, %26, %cst_11 {dimension_numbers = #tpu.dot_dimension_numbers<[1], [1], [2], [2], [0, 0, 0, 2, 1, 2], [0], [0]>} : vector<8x4x64xf32>, vector<8x4x64xf32>, vector<8x64x64xf32> -> vector<8x64x64xf32>
    %cst_12 = arith.constant dense<0xFF800000> : vector<8x64xf32>
    %30 = vector.multi_reduction <maximumf>, %29, %cst_12 [2] : vector<8x64x64xf32> to vector<8x64xf32>
    %31 = vector.shape_cast %30 : vector<8x64xf32> to vector<8x64x1xf32>
    %32 = vector.broadcast %31 : vector<8x64x1xf32> to vector<8x64x64xf32>
    %33 = arith.subf %29, %32 : vector<8x64x64xf32>
    %34 = math.exp %33 : vector<8x64x64xf32>
    %cst_13 = arith.constant dense<0.000000e+00> : vector<8x64xf32>
    %35 = vector.multi_reduction <add>, %34, %cst_13 [2] : vector<8x64x64xf32> to vector<8x64xf32>
    %36 = vector.shape_cast %35 : vector<8x64xf32> to vector<8x64x1xf32>
    %cst_14 = arith.constant 1.000000e+00 : f32
    %37 = vector.broadcast %cst_14 : f32 to vector<8x64x1xf32>
    %38 = arith.divf %37, %36 : vector<8x64x1xf32>
    %39 = vector.broadcast %38 : vector<8x64x1xf32> to vector<8x64x64xf32>
    %40 = arith.mulf %34, %39 : vector<8x64x64xf32>
    %cst_15 = arith.constant dense<0.000000e+00> : vector<8x4x64xf32>
    %41 = tpu.matmul %28, %40, %cst_15 {dimension_numbers = #tpu.dot_dimension_numbers<[2], [2], [1], [1], [0, 0, 0, 1, 1, 1], [0], [0]>} : vector<8x4x64xf32>, vector<8x64x64xf32>, vector<8x4x64xf32> -> vector<8x4x64xf32>
    %42 = vector.shape_cast %41 : vector<8x4x64xf32> to vector<32x64xf32>
    %c0_16 = arith.constant 0 : index
    %c0_17 = arith.constant 0 : index
    %43 = vector.load %arg4[%c0_16, %c0_17] : memref<32x32xf32, #tpu.memory_space<vmem>>, vector<32x32xf32>
    %cst_18 = arith.constant dense<0.000000e+00> : vector<32x64xf32>
    %44 = tpu.matmul %43, %42, %cst_18 {dimension_numbers = #tpu.dot_dimension_numbers<[1], [0], [0], [1], [0, 0, 1, 1], [], []>} : vector<32x32xf32>, vector<32x64xf32>, vector<32x64xf32> -> vector<32x64xf32>
    %c0_19 = arith.constant 0 : index
    %c0_20 = arith.constant 0 : index
    %45 = vector.load %arg5[%c0_19, %c0_20] : memref<32x1xf32, #tpu.memory_space<vmem>>, vector<32x1xf32>
    %46 = vector.broadcast %45 : vector<32x1xf32> to vector<32x64xf32>
    %47 = arith.addf %44, %46 : vector<32x64xf32>
    %c0_21 = arith.constant 0 : index
    %c0_22 = arith.constant 0 : index
    %c0_23 = arith.constant 0 : index
    %48 = vector.load %arg6[%c0_21, %c0_22, %c0_23] : memref<1x32x64xf32, #tpu.memory_space<vmem>>, vector<1x32x64xf32>
    %49 = vector.shape_cast %48 : vector<1x32x64xf32> to vector<32x64xf32>
    %50 = vector.shape_cast %47 : vector<32x64xf32> to vector<1x32x64xf32>
    tpu.vector_store %arg6[%c0_21, %c0_22, %c0_23], %50 {strides = array<i32>} : memref<1x32x64xf32, #tpu.memory_space<vmem>>, vector<1x32x64xf32>,
    return
  }
  func.func @transform_0(%arg0: i32) -> (i32, i32, i32) {
    %c0_i32 = arith.constant 0 : i32
    %c0_i32_0 = arith.constant 0 : i32
    %c0_i32_1 = arith.constant 0 : i32
    return %arg0, %c0_i32, %c0_i32_0 : i32, i32, i32
  }
  func.func @transform_1(%arg0: i32) -> (i32, i32) {
    %c0_i32 = arith.constant 0 : i32
    %c0_i32_0 = arith.constant 0 : i32
    %c0_i32_1 = arith.constant 0 : i32
    return %c0_i32, %c0_i32_0 : i32, i32
  }
  func.func @transform_2(%arg0: i32) -> (i32, i32) {
    %c0_i32 = arith.constant 0 : i32
    %c0_i32_0 = arith.constant 0 : i32
    %c0_i32_1 = arith.constant 0 : i32
    return %c0_i32, %c0_i32_0 : i32, i32
  }
  func.func @transform_3(%arg0: i32) -> (i32, i32) {
    %c0_i32 = arith.constant 0 : i32
    %c0_i32_0 = arith.constant 0 : i32
    %c0_i32_1 = arith.constant 0 : i32
    return %c0_i32, %c0_i32_0 : i32, i32
  }
  func.func @transform_4(%arg0: i32) -> (i32, i32) {
    %c0_i32 = arith.constant 0 : i32
    %c0_i32_0 = arith.constant 0 : i32
    %c0_i32_1 = arith.constant 0 : i32
    return %c0_i32, %c0_i32_0 : i32, i32
  }
  func.func @transform_5(%arg0: i32) -> (i32, i32, i32) {
    %c0_i32 = arith.constant 0 : i32
    %c0_i32_0 = arith.constant 0 : i32
    %c0_i32_1 = arith.constant 0 : i32
    return %arg0, %c0_i32, %c0_i32_0 : i32, i32, i32
  }
}

</mosaic_0001>

<bundles_post_ra>
// kernel: mul.6
= control target key start
LH: loop header
LB: loop body
LE: loop exit
PB: predicated region body
PF: predicated region fallthrough
CT: control target
= control target key end

     0   :  { %s276_s0 = inlined_call_operand.vmem [shape: f32[96,1], index: 0, kind: input, shape index: {}]   ;;  %s277_s1 = inlined_call_operand.vmem [shape: f32[96,1], index: 1, kind: input, shape index: {}]   ;;  %s278_s2 = inlined_call_operand.vmem [shape: f32[96,1], index: 2, kind: output, shape index: {}]  }
   0x1   :  { %v3_v0 = vld [vmem:[%s276_s0] sm:$0xff]  ;;  %v120_v2 = vld [vmem:[%s276_s0 + $0x8] sm:$0xff]  ;;  %v123_v5 = vld [vmem:[%s276_s0 + $0x10] sm:$0xff] }
   0x2   :  { %v4_v1 = vld [vmem:[%s277_s1] sm:$0xff]  ;;  %v121_v4 = vld [vmem:[%s277_s1 + $0x8] sm:$0xff]  ;;  %v124_v6 = vld [vmem:[%s277_s1 + $0x10] sm:$0xff] }
   0x3   :  { %v7_v3 = vmul.f32 %v4_v1, %v3_v0  ;;  %v16_v7 = vmul.f32 %v121_v4, %v120_v2  ;;  %v26_v8 = vmul.f32 %v124_v6, %v123_v5  ;;  %v126_v9 = vld [vmem:[%s276_s0 + $0x18] sm:$0xff]  ;;  %v129_v11 = vld [vmem:[%s276_s0 + $0x20] sm:$0xff]  ;;  %v132_v14 = vld [vmem:[%s276_s0 + $0x28] sm:$0xff] }
   0x4   :  { %v127_v10 = vld [vmem:[%s277_s1 + $0x18] sm:$0xff]  ;;  %v130_v13 = vld [vmem:[%s277_s1 + $0x20] sm:$0xff]  ;;  %v133_v15 = vld [vmem:[%s277_s1 + $0x28] sm:$0xff] }
   0x5   :  { %9 = vst [vmem:[%s278_s2] sm:$0xff] %v7_v3  ;;  %v36_v12 = vmul.f32 %v127_v10, %v126_v9  ;;  %122 = vst [vmem:[%s278_s2 + $0x8] sm:$0xff] %v16_v7  ;;  %v46_v16 = vmul.f32 %v130_v13, %v129_v11  ;;  %v56_v17 = vmul.f32 %v133_v15, %v132_v14  ;;  %v135_v18 = vld [vmem:[%s276_s0 + $0x30] sm:$0xff]  ;;  %v138_v20 = vld [vmem:[%s276_s0 + $0x38] sm:$0xff] }
   0x6   :  { %125 = vst [vmem:[%s278_s2 + $0x10] sm:$0xff] %v26_v8  ;;  %v136_v19 = vld [vmem:[%s277_s1 + $0x30] sm:$0xff]  ;;  %v139_v22 = vld [vmem:[%s277_s1 + $0x38] sm:$0xff]  ;;  %v141_v23 = vld [vmem:[%s276_s0 + $0x40] sm:$0xff] }
   0x7   :  { %128 = vst [vmem:[%s278_s2 + $0x18] sm:$0xff] %v36_v12  ;;  %v66_v21 = vmul.f32 %v136_v19, %v135_v18  ;;  %v142_v24 = vld [vmem:[%s277_s1 + $0x40] sm:$0xff]  ;;  %131 = vst [vmem:[%s278_s2 + $0x20] sm:$0xff] %v46_v16  ;;  %v76_v25 = vmul.f32 %v139_v22, %v138_v20  ;;  %v144_v27 = vld [vmem:[%s276_s0 + $0x48] sm:$0xff] }
   0x8   :  { %134 = vst [vmem:[%s278_s2 + $0x28] sm:$0xff] %v56_v17  ;;  %v86_v26 = vmul.f32 %v142_v24, %v141_v23  ;;  %v145_v28 = vld [vmem:[%s277_s1 + $0x48] sm:$0xff]  ;;  %v147_v29 = vld [vmem:[%s276_s0 + $0x50] sm:$0xff]  ;;  %v150_v32 = vld [vmem:[%s276_s0 + $0x58] sm:$0xff] }
   0x9   :  { %137 = vst [vmem:[%s278_s2 + $0x30] sm:$0xff] %v66_v21  ;;  %v96_v30 = vmul.f32 %v145_v28, %v144_v27  ;;  %v148_v31 = vld [vmem:[%s277_s1 + $0x50] sm:$0xff]  ;;  %v151_v33 = vld [vmem:[%s277_s1 + $0x58] sm:$0xff]  ;;  %140 = vst [vmem:[%s278_s2 + $0x38] sm:$0xff] %v76_v25 }
   0xa   :  { %143 = vst [vmem:[%s278_s2 + $0x40] sm:$0xff] %v86_v26  ;;  %v106_v34 = vmul.f32 %v148_v31, %v147_v29  ;;  %v116_v35 = vmul.f32 %v151_v33, %v150_v32 }
   0xb   :  { %146 = vst [vmem:[%s278_s2 + $0x48] sm:$0xff] %v96_v30 }
   0xc   :  { %149 = vst [vmem:[%s278_s2 + $0x50] sm:$0xff] %v106_v34  ;;  %152 = vst [vmem:[%s278_s2 + $0x58] sm:$0xff] %v116_v35 }

// kernel: msa_forward.1
= control target key start
LH: loop header
LB: loop body
LE: loop exit
PB: predicated region body
PF: predicated region fallthrough
CT: control target
= control target key end

     0   :  { %s4694_s18 = smov 0   ;;  %s5876_s0 = inlined_call_operand.vmem [shape: f32[2,32,64], index: 0, kind: input, shape index: {}]   ;;  %s5877_s1 = inlined_call_operand.vmem [shape: f32[96,32], index: 1, kind: input, shape index: {}]   ;;  %s5878_s2 = inlined_call_operand.vmem [shape: f32[96,1], index: 2, kind: input, shape index: {}]   ;;  %s5879_s3 = inlined_call_operand.vmem [shape: f32[32,32], index: 3, kind: input, shape index: {}]   ;;  %s5880_s4 = inlined_call_operand.vmem [shape: f32[32,1], index: 4, kind: input, shape index: {}]   ;;  %s5881_s5 = inlined_call_operand.vmem [shape: f32[2,32,64], index: 5, kind: output, shape index: {}]  }
   0x1 LB: > { %s3589_s19 = sadd.s32 4294967295, %s4658_s18   ;;  %p3593_p0 = scmp.ge.s32.totalorder %s4658_s18, 1  ;;  %s4658_s18 = sphi %s4694_s18, %s15_s18  }
   0x2   : > { %p187_p1 = scmp.lt.s32.totalorder %s4658_s18, 3 }
   0x4   : > { %p188_p2 = pnand %p3593_p0, %p187_p1 }
   0x6   : > { %191 = sbr.rel (%p188_p2) target bundleno = 1708 (0x6ac), region = 40 }
   0xd   : > { %p215_p3 = scmp.lt.s32.totalorder %s3589_s19, 1  ;;  %v273_v0 = vld [vmem:[%s5877_s1] sm:$0xff]  ;;  %vm357_vm0 = vcmask 261120   ;;  %v4660_v1 = vmov 0   ;;  %vm229_vm1 = vcmask 523264   ;;  %v286_v3 = vld [vmem:[%s5878_s2 + $0x8] sm:$0xff] }
   0xe   : > { %3938 = vmatprep.mubr.msk.f32.mxu0 %vm357_vm0, %v273_v0  ;;  %4392 = vset.pattern.permute.xlu0 %v4660_v1  ;;  %v285_v2 = vld [vmem:[%s5878_s2] sm:$0xff]  ;;  %v291_v5 = vld [vmem:[%s5878_s2 + $0x30] sm:$0xff]  ;;  %v290_v18 = vld [vmem:[%s5878_s2 + $0x28] sm:$0xff]  ;;  %vm604_vm2 = vcmask 1043456   ;;  %vm579_vm3 = vcmask 31744   ;;  %vm4662_vm4 = vmmov 0  }
   0xf   : > { %s6011_s19 = smov (!%p215_p3, %s3589_s19), 1  ;;  %4393 = vset.pattern.permute.xlu1 %v4660_v1  ;;  %299 = vperm.xlu0 %4392, %v285_v2   ;;  %v289_v4 = vld [vmem:[%s5878_s2 + $0x20] sm:$0xff]  ;;  %v287_v14 = vld [vmem:[%s5878_s2 + $0x10] sm:$0xff]  ;;  %v288_v21 = vld [vmem:[%s5878_s2 + $0x18] sm:$0xff] }
  0x10   : > { %s3760_s24 = sshll.u32 %s6011_s19, 5  ;;  %319 = vperm.xlu1 %4393, %v289_v4   ;;  %v274_v57 = vld [vmem:[%s5877_s1 + $0x8] sm:$0xff]  ;;  %v275_v58 = vld [vmem:[%s5877_s1 + $0x10] sm:$0xff]  ;;  %v276_v59 = vld [vmem:[%s5877_s1 + $0x18] sm:$0xff] }
  0x11   : > { %s219_s6 = scalar_lea.vmem %s5876_s0, %s3760_s24  ;;  %v277_v60 = vld [vmem:[%s5877_s1 + $0x20] sm:$0xff]  ;;  %v278_v61 = vld [vmem:[%s5877_s1 + $0x28] sm:$0xff]  ;;  %v279_v62 = vld [vmem:[%s5877_s1 + $0x30] sm:$0xff]  ;;  %s224_s23 = scalar_lea.vmem %s5881_s5, %s3760_s24 }
  0x12   : > { %v225_v6 = vld [vmem:[%s219_s6] sm:$0xff]  ;;  %v226_v7 = vld [vmem:[%s219_s6 + $0x8] sm:$0xff]  ;;  %v227_v8 = vld [vmem:[%s219_s6 + $0x10] sm:$0xff] }
  0x13   : > { %v228_v9 = vld [vmem:[%s219_s6 + $0x18] sm:$0xff]  ;;  %v230_v10 = vsel %vm229_vm1, %v225_v6, 0.0  ;;  %v231_v11 = vsel %vm229_vm1, %v226_v7, 0.0  ;;  %v233_v12 = vsel %vm229_vm1, %v227_v8, 0.0  ;;  %304 = vperm.xlu0 %4392, %v286_v3   ;;  %v281_v0 = vld [vmem:[%s5877_s1 + $0x40] sm:$0xff]  ;;  %v282_v1 = vld [vmem:[%s5877_s1 + $0x48] sm:$0xff] }
  0x14   : > { %v232_v13 = vadd.f32 %v231_v11, %v230_v10  ;;  %v235_v15 = vsel %vm229_vm1, %v228_v9, 0.0  ;;  %329 = vperm.xlu1 %4393, %v291_v5   ;;  %v280_v63 = vld [vmem:[%s5877_s1 + $0x38] sm:$0xff]  ;;  %v283_v2 = vld [vmem:[%s5877_s1 + $0x50] sm:$0xff]  ;;  %vm5498_vm5 = vmpackc.low %vm229_vm1, %vm229_vm1 }
  0x15   : > { %v284_v10 = vld [vmem:[%s5877_s1 + $0x58] sm:$0xff] }
  0x16   : > { %v234_v16 = vadd.f32 %v233_v12, %v232_v13 }
  0x17   : > { %309 = vperm.xlu0 %4392, %v287_v14  }
  0x18   : > { %v236_v17 = vadd.f32 %v235_v15, %v234_v16 }
  0x1a   : > { %v237_v19 = vrot.slane %v236_v17, 4 }
  0x1b   : > { %324 = vperm.xlu0 %4392, %v290_v18  }
  0x1c   : > { %v238_v20 = vadd.f32 %v237_v19, %v236_v17 }
  0x1e   : > { %v239_v22 = vrot.slane %v238_v20, 2 }
  0x1f   : > { %314 = vperm.xlu0 %4392, %v288_v21  }
  0x20   : > { %v240_v23 = vadd.f32 %v239_v22, %v238_v20 }
  0x22   : > { %v241_v24 = vrot.slane %v240_v23, 1 }
  0x24   : > { %v242_v25 = vadd.f32 %v241_v24, %v240_v23 }
  0x26   : > { %v244_v26 = vmul.f32 0.03125, %v242_v25 }
  0x28   : > { %v245_v27 = vsub.f32 %v225_v6, %v244_v26  ;;  %v246_v28 = vsub.f32 %v226_v7, %v244_v26  ;;  %v247_v29 = vsub.f32 %v227_v8, %v244_v26  ;;  %v248_v30 = vsub.f32 %v228_v9, %v244_v26 }
  0x2a   : > { %v249_v31 = vmul.f32 %v245_v27, %v245_v27  ;;  %v250_v32 = vmul.f32 %v246_v28, %v246_v28  ;;  %v251_v33 = vmul.f32 %v247_v29, %v247_v29  ;;  %v252_v34 = vmul.f32 %v248_v30, %v248_v30 }
  0x2c   : > { %v253_v35 = vsel %vm229_vm1, %v249_v31, 0.0  ;;  %v254_v36 = vsel %vm229_vm1, %v250_v32, 0.0  ;;  %v256_v37 = vsel %vm229_vm1, %v251_v33, 0.0  ;;  %v258_v39 = vsel %vm229_vm1, %v252_v34, 0.0 }
  0x2d   : > { %v255_v38 = vadd.f32 %v254_v36, %v253_v35 }
  0x2f   : > { %v257_v40 = vadd.f32 %v256_v37, %v255_v38 }
  0x31   : > { %v259_v41 = vadd.f32 %v258_v39, %v257_v40 }
  0x33   : > { %v260_v42 = vrot.slane %v259_v41, 4 }
  0x35   : > { %v261_v43 = vadd.f32 %v260_v42, %v259_v41 }
  0x37   : > { %v262_v44 = vrot.slane %v261_v43, 2 }
  0x39   : > { %v263_v45 = vadd.f32 %v262_v44, %v261_v43 }
  0x3b   : > { %v264_v46 = vrot.slane %v263_v45, 1 }
  0x3d   : > { %v265_v47 = vadd.f32 %v264_v46, %v263_v45 }
  0x3f   : > { %v266_v48 = vmul.f32 0.03125, %v265_v47 }
  0x41   : > { %v267_v49 = vadd.f32 1e-05, %v266_v48 }
  0x43   : > { %4394 = vrsqrt.f32 %v267_v49 }
  0x4d   : > { %v4395_v50 = vpop.eup %4394 }
  0x4e   : > { %v269_v51 = vmul.f32 %v4395_v50, %v245_v27  ;;  %v270_v52 = vmul.f32 %v4395_v50, %v246_v28  ;;  %v271_v53 = vmul.f32 %v4395_v50, %v247_v29  ;;  %v272_v54 = vmul.f32 %v4395_v50, %v248_v30  ;;  %v292_v28 = vld [vmem:[%s5878_s2 + $0x38] sm:$0xff] }
  0x50   : > { %v4234_v55 = vpack.c.bf16 %v270_v52, %v269_v51  ;;  %v4238_v56 = vpack.c.bf16 %v272_v54, %v271_v53 }
  0x52   : > { %4235 = vmatprep.subr.bf16.mxu0 %v4234_v55 }
  0x53   : > { %4237 = vmatpush3.bf16.msra.mxu0 %v4234_v55 }
  0x54   : > { %4239 = vmatprep.subr.bf16.mxu0 %v4238_v56 }
  0x57   : > { %4241 = vmatpush3.bf16.msra.mxu0 %v4238_v56 }
  0x5a   : > { %3939 = vmatmul.mubr.msk.f32.vlgmr.msra.gmra.mrb[0].mxu0 %vm357_vm0, %v274_v57 }
  0x5b   : > { %3941 = vmatprep.mubr.msk.f32.mxu0 %vm357_vm0, %v275_v58 }
  0x5e   : > { %3942 = vmatmul.mubr.msk.f32.gmra.mrb[2].mxu0 %vm357_vm0, %v276_v59 }
  0x5f   : > { %3944 = vmatprep.mubr.msk.f32.mxu0 %vm357_vm0, %v277_v60 }
  0x62   : > { %3945 = vmatmul.mubr.msk.f32.gmra.mrb[4].mxu0 %vm357_vm0, %v278_v61 }
  0x63   : > { %3947 = vmatprep.mubr.msk.f32.mxu0 %vm357_vm0, %v279_v62 }
  0x66   : > { %3948 = vmatmul.mubr.msk.f32.gmra.mrb[6].mxu0 %vm357_vm0, %v280_v63 }
  0x67   : > { %3950 = vmatprep.mubr.msk.f32.mxu0 %vm357_vm0, %v281_v0 }
  0x6a   : > { %3951 = vmatmul.mubr.msk.f32.gmra.mrb[8].mxu0 %vm357_vm0, %v282_v1 }
  0x6b   : > { %3953 = vmatprep.mubr.msk.f32.mxu0 %vm357_vm0, %v283_v2 }
  0x6e   : > { %3954 = vmatmul.mubr.msk.f32.gmra.mrb[10].mxu0 %vm357_vm0, %v284_v10 }
  0x8e   : > { %v300_v3 = vpop.permute.xlu0 %299 }
  0x8f   : > { %v320_v14 = vpop.permute.xlu1 %319 }
  0x92   : > { %v305_v4 = vpop.permute.xlu0 %304 }
  0x93   : > { %v330_v20 = vpop.permute.xlu1 %329 }
  0x96   : > { %v310_v8 = vpop.permute.xlu0 %309 }
  0x9a   : > { %v325_v15 = vpop.permute.xlu0 %324 }
  0x9e   : > { %v315_v29 = vpop.permute.xlu0 %314 }
 0x12d   : > { %v3940_v5 = vpop.f32.mrb[0].mxu0 }
 0x12e   : > { %v466_v6 = vadd.f32 %v3940_v5, %v305_v4  ;;  %v460_v7 = vpop.f32.mrb[1].mxu0 }
 0x12f   : > { %v461_v9 = vadd.f32 %v460_v7, %v300_v3  ;;  %v293_v7 = vld [vmem:[%s5878_s2 + $0x40] sm:$0xff] }
 0x130   : > { %875 = vxpose.xlu1.b32.start.end [1/1] (short) (narrow) %v466_v6, 64  ;;  %v524_v25 = vcombine.high %v466_v6, %v466_v6 }
 0x131   : > { %v523_v11 = vcombine.high %v461_v9, %v461_v9  ;;  %v3943_v12 = vpop.f32.mrb[2].mxu0 }
 0x132   : > { %v470_v13 = vpop.f32.mrb[3].mxu0  ;;  %v476_v30 = vadd.f32 %v3943_v12, %v315_v29 }
 0x133   : > { %712 = vxpose.xlu0.b32.start.end [1/1] (short) (narrow) %v523_v11, 64  ;;  %v471_v26 = vadd.f32 %v470_v13, %v310_v8 }
 0x134   : > { %v526_v44 = vcombine.high %v476_v30, %v476_v30 }
 0x135   : > { %v3946_v16 = vpop.f32.mrb[4].mxu0  ;;  %v525_v27 = vcombine.high %v471_v26, %v471_v26 }
 0x136   : > { %v4787_v17 = vadd.f32 %v3946_v16, %v325_v15  ;;  %v480_v18 = vpop.f32.mrb[5].mxu0 }
 0x137   : > { %v481_v19 = vadd.f32 %v480_v18, %v320_v14 }
 0x138   : > { %3984 = vmatprep.subr.msk.mxu0 %vm604_vm2, %v4787_v17  ;;  %v536_v2 = vcombine.high %v4787_v17, %v4787_v17 }
 0x139   : > { %3985 = vmatpush3.msk.msra.mxu0 %vm604_vm2, %v4787_v17  ;;  %v535_v21 = vcombine.high %v481_v19, %v481_v19  ;;  %v4793_v22 = vpop.f32.mrb[6].mxu0  ;;  %3956 = vmatprep.subr.msk.mxu1 %vm604_vm2, %v481_v19 }
 0x13a   : > { %v490_v23 = vpop.f32.mrb[7].mxu0  ;;  %3957 = vmatpush3.msk.msra.mxu1 %vm604_vm2, %v481_v19 }
 0x13b   : > { %v4797_v24 = vadd.f32 %v490_v23, %v330_v20  ;;  %3970 = vmatprep.subr.msk.mxu1 %vm604_vm2, %v535_v21 }
 0x13d   : > { %4012 = vmatprep.subr.msk.mxu0 %vm604_vm2, %v4797_v24  ;;  %v4823_v63 = vpop.f32.mrb[8].mxu0  ;;  %v537_v6 = vcombine.high %v4797_v24, %v4797_v24 }
 0x13e   : > { %5922 = vst [vmem:[#allocation2_spill] sm:$0xff] %v4823_v63  ;;  %v4826_v0 = vpop.f32.mrb[9].mxu0 }
 0x13f   : > { %5923 = vst [vmem:[#allocation3_spill] sm:$0xff] %v4826_v0 }
 0x141   : > { %v4851_v8 = vpop.f32.mrb[10].mxu0 }
 0x142   : > { %5924 = vst [vmem:[#allocation4_spill] sm:$0xff] %v4851_v8  ;;  %v4857_v12 = vpop.f32.mrb[11].mxu0 }
 0x143   : > { %5925 = vst [vmem:[#allocation5_spill] sm:$0xff] %v4857_v12 }
 0x14d   : > { %547 = vxpose.xlu1.b32.start.end [1/1] (short) (narrow) %v461_v9, 64 }
 0x150   : > { %1038 = vxpose.xlu0.b32.start.end [1/1] (short) (narrow) %v524_v25, 64 }
 0x16d   : > { %1364 = vxpose.xlu0.b32.start.end [1/1] (short) (narrow) %v525_v27, 64 }
 0x187   : > { %334 = vperm.xlu1 %4393, %v292_v28  }
 0x18a   : > { %1527 = vxpose.xlu0.b32.start.end [1/1] (short) (narrow) %v476_v30, 64 }
 0x1b0   : > { %v891_v31 = vpop.trf.xlu1  ;;  %1201 = vxpose.xlu1.b32.start.end [1/1] (short) (narrow) %v471_v26, 64 }
 0x1b1   : > { %3986 = vmatprep.mubr.msk.f32.mxu0 %vm579_vm3, %v891_v31 }
 0x1b3   : > { %v728_v32 = vpop.trf.xlu0 }
 0x1b4   : > { %v892_v33 = vpop.trf.xlu1 }
 0x1b5   : > { %3987 = vmatmul.mubr.msk.f32.vlgmr.msra.gmra.mrb[12].mxu0 %vm579_vm3, %v892_v33 }
 0x1b6   : > { %4013 = vmatpush3.msk.msra.mxu0 %vm604_vm2, %v4797_v24 }
 0x1b7   : > { %v729_v34 = vpop.trf.xlu0 }
 0x1b8   : > { %v893_v35 = vpop.trf.xlu1 }
 0x1b9   : > { %3989 = vmatprep.mubr.msk.f32.mxu0 %vm579_vm3, %v893_v35 }
 0x1bb   : > { %v730_v36 = vpop.trf.xlu0 }
 0x1bc   : > { %v894_v37 = vpop.trf.xlu1 }
 0x1bd   : > { %3990 = vmatmul.mubr.msk.f32.gmra.mrb[14].mxu0 %vm579_vm3, %v894_v37 }
 0x1bf   : > { %v731_v38 = vpop.trf.xlu0 }
 0x1c0   : > { %v895_v39 = vpop.trf.xlu1 }
 0x1c1   : > { %3992 = vmatprep.mubr.msk.f32.mxu0 %vm579_vm3, %v895_v39 }
 0x1c3   : > { %v732_v40 = vpop.trf.xlu0 }
 0x1c4   : > { %v896_v41 = vpop.trf.xlu1 }
 0x1c5   : > { %3993 = vmatmul.mubr.msk.f32.gmra.mrb[16].mxu0 %vm579_vm3, %v896_v41 }
 0x1c7   : > { %v733_v42 = vpop.trf.xlu0 }
 0x1c8   : > { %v897_v43 = vpop.trf.xlu1 }
 0x1cb   : > { %v734_v45 = vpop.trf.xlu0 }
 0x1cc   : > { %v898_v46 = vpop.trf.xlu1 }
 0x1cd   : > { %1690 = vxpose.xlu1.b32.start.end [1/1] (short) (narrow) %v526_v44, 64 }
 0x1cf   : > { %v735_v47 = vpop.trf.xlu0 }
 0x1d0   : > { %v563_v48 = vpop.trf.xlu1 }
 0x1d1   : > { %3958 = vmatprep.mubr.msk.f32.mxu1 %vm579_vm3, %v563_v48 }
 0x1d3   : > { %v1054_v49 = vpop.trf.xlu0 }
 0x1d4   : > { %v564_v50 = vpop.trf.xlu1 }
 0x1d5   : > { %3959 = vmatmul.mubr.msk.f32.vlgmr.msra.gmra.mrb[0].mxu1 %vm579_vm3, %v564_v50 }
 0x1d6   : > { %3971 = vmatpush3.msk.msra.mxu1 %vm604_vm2, %v535_v21 }
 0x1d7   : > { %4378 = vmatprep.subr.msk.mxu1 %vm604_vm2, %v4787_v17  ;;  %v1055_v51 = vpop.trf.xlu0 }
 0x1d8   : > { %v565_v52 = vpop.trf.xlu1 }
 0x1d9   : > { %3961 = vmatprep.mubr.msk.f32.mxu1 %vm579_vm3, %v565_v52 }
 0x1db   : > { %v1056_v53 = vpop.trf.xlu0 }
 0x1dc   : > { %v566_v54 = vpop.trf.xlu1 }
 0x1dd   : > { %3962 = vmatmul.mubr.msk.f32.gmra.mrb[2].mxu1 %vm579_vm3, %v566_v54 }
 0x1df   : > { %v1057_v55 = vpop.trf.xlu0 }
 0x1e0   : > { %v567_v56 = vpop.trf.xlu1 }
 0x1e1   : > { %3964 = vmatprep.mubr.msk.f32.mxu1 %vm579_vm3, %v567_v56 }
 0x1e3   : > { %v1058_v57 = vpop.trf.xlu0 }
 0x1e4   : > { %v568_v58 = vpop.trf.xlu1 }
 0x1e5   : > { %3965 = vmatmul.mubr.msk.f32.gmra.mrb[4].mxu1 %vm579_vm3, %v568_v58 }
 0x1e7   : > { %v1059_v59 = vpop.trf.xlu0 }
 0x1e8   : > { %v569_v60 = vpop.trf.xlu1 }
 0x1e9   : > { %3967 = vmatprep.mubr.msk.f32.mxu1 %vm579_vm3, %v569_v60 }
 0x1eb   : > { %v1060_v61 = vpop.trf.xlu0 }
 0x1ec   : > { %v570_v62 = vpop.trf.xlu1 }
 0x1ed   : > { %3968 = vmatmul.mubr.msk.f32.gmra.mrb[6].mxu1 %vm579_vm3, %v570_v62 }
 0x1ee   : > { %3972 = vmatprep.mubr.msk.f32.mxu1 %vm579_vm3, %v728_v32 }
 0x1ef   : > { %v1061_v1 = vpop.trf.xlu0 }
 0x1f1   : > { %3973 = vmatmul.mubr.msk.f32.vlgmr.msra.gmra.mrb[8].mxu1 %vm579_vm3, %v729_v34 }
 0x1f2   : > { %4379 = vmatpush3.msk.msra.mxu1 %vm604_vm2, %v4787_v17  ;;  %3975 = vmatprep.mubr.msk.f32.mxu1 %vm579_vm3, %v730_v36 }
 0x1f3   : > { %3998 = vmatprep.subr.msk.mxu1 %vm604_vm2, %v536_v2  ;;  %v1380_v3 = vpop.trf.xlu0 }
 0x1f5   : > { %3976 = vmatmul.mubr.msk.f32.gmra.mrb[10].mxu1 %vm579_vm3, %v731_v38 }
 0x1f6   : > { %3978 = vmatprep.mubr.msk.f32.mxu1 %vm579_vm3, %v732_v40 }
 0x1f7   : > { %v1381_v4 = vpop.trf.xlu0 }
 0x1f9   : > { %3979 = vmatmul.mubr.msk.f32.gmra.mrb[12].mxu1 %vm579_vm3, %v733_v42 }
 0x1fa   : > { %3981 = vmatprep.mubr.msk.f32.mxu1 %vm579_vm3, %v734_v45 }
 0x1fb   : > { %v1382_v5 = vpop.trf.xlu0 }
 0x1fd   : > { %3982 = vmatmul.mubr.msk.f32.gmra.mrb[14].mxu1 %vm579_vm3, %v735_v47 }
 0x1fe   : > { %3995 = vmatprep.mubr.msk.f32.mxu1 %vm579_vm3, %v897_v43 }
 0x1ff   : > { %v1383_v10 = vpop.trf.xlu0 }
 0x201   : > { %3996 = vmatmul.mubr.msk.f32.vlgmr.msra.gmra.mrb[16].mxu1 %vm579_vm3, %v898_v46 }
 0x202   : > { %3999 = vmatpush3.msk.msra.mxu1 %vm604_vm2, %v536_v2  ;;  %4000 = vmatprep.mubr.msk.f32.mxu1 %vm579_vm3, %v1054_v49 }
 0x203   : > { %4026 = vmatprep.subr.msk.mxu1 %vm604_vm2, %v537_v6  ;;  %v1384_v14 = vpop.trf.xlu0 }
 0x205   : > { %4001 = vmatmul.mubr.msk.f32.vlgmr.msra.gmra.mrb[18].mxu1 %vm579_vm3, %v1055_v51 }
 0x206   : > { %4027 = vmatpush3.msk.msra.mxu1 %vm604_vm2, %v537_v6  ;;  %v335_v9 = vpop.permute.xlu1 %334  ;;  %4003 = vmatprep.mubr.msk.f32.mxu1 %vm579_vm3, %v1056_v53 }
 0x207   : > { %v496_v11 = vadd.f32 %v4793_v22, %v335_v9  ;;  %339 = vperm.xlu1 %4393, %v293_v7   ;;  %v1385_v15 = vpop.trf.xlu0 }
 0x209   : > { %v538_v13 = vcombine.high %v496_v11, %v496_v11  ;;  %4004 = vmatmul.mubr.msk.f32.gmra.mrb[20].mxu1 %vm579_vm3, %v1057_v55  ;;  %4040 = vmatprep.subr.msk.mxu0 %vm604_vm2, %v496_v11 }
 0x20a   : > { %4006 = vmatprep.mubr.msk.f32.mxu1 %vm579_vm3, %v1058_v57 }
 0x20b   : > { %4054 = vmatprep.subr.msk.mxu1 %vm604_vm2, %v538_v13  ;;  %v1386_v16 = vpop.trf.xlu0 }
 0x20d   : > { %4007 = vmatmul.mubr.msk.f32.gmra.mrb[22].mxu1 %vm579_vm3, %v1059_v59 }
 0x20e   : > { %4009 = vmatprep.mubr.msk.f32.mxu1 %vm579_vm3, %v1060_v61 }
 0x20f   : > { %v1387_v17 = vpop.trf.xlu0 }
 0x211   : > { %4010 = vmatmul.mubr.msk.f32.gmra.mrb[24].mxu1 %vm579_vm3, %v1061_v1 }
 0x212   : > { %4028 = vmatprep.mubr.msk.f32.mxu1 %vm579_vm3, %v1380_v3 }
 0x213   : > { %v1543_v19 = vpop.trf.xlu0 }
 0x215   : > { %4029 = vmatmul.mubr.msk.f32.vlgmr.msra.gmra.mrb[26].mxu1 %vm579_vm3, %v1381_v4 }
 0x216   : > { %4055 = vmatpush3.msk.msra.mxu1 %vm604_vm2, %v538_v13  ;;  %4031 = vmatprep.mubr.msk.f32.mxu1 %vm579_vm3, %v1382_v5 }
 0x217   : > { %v1544_v21 = vpop.trf.xlu0 }
 0x219   : > { %4032 = vmatmul.mubr.msk.f32.gmra.mrb[28].mxu1 %vm579_vm3, %v1383_v10 }
 0x21a   : > { %4034 = vmatprep.mubr.msk.f32.mxu1 %vm579_vm3, %v1384_v14 }
 0x21b   : > { %v1545_v24 = vpop.trf.xlu0 }
 0x21d   : > { %4035 = vmatmul.mubr.msk.f32.gmra.mrb[30].mxu1 %vm579_vm3, %v1385_v15 }
 0x21e   : > { %4037 = vmatprep.mubr.msk.f32.mxu1 %vm579_vm3, %v1386_v16 }
 0x21f   : > { %v1546_v26 = vpop.trf.xlu0 }
 0x221   : > { %4038 = vmatmul.mubr.msk.f32.gmra.mrb[32].mxu1 %vm579_vm3, %v1387_v17 }
 0x223   : > { %v1547_v29 = vpop.trf.xlu0 }
 0x227   : > { %v1548_v31 = vpop.trf.xlu0 }
 0x22b   : > { %v1549_v33 = vpop.trf.xlu0 }
 0x22f   : > { %v1550_v36 = vpop.trf.xlu0 }
 0x230   : > { %v1217_v18 = vpop.trf.xlu1 }
 0x231   : > { %4014 = vmatprep.mubr.msk.f32.mxu0 %vm579_vm3, %v1217_v18 }
 0x234   : > { %v1218_v20 = vpop.trf.xlu1 }
 0x235   : > { %4015 = vmatmul.mubr.msk.f32.vlgmr.msra.gmra.mrb[18].mxu0 %vm579_vm3, %v1218_v20 }
 0x236   : > { %4041 = vmatpush3.msk.msra.mxu0 %vm604_vm2, %v496_v11 }
 0x238   : > { %v1219_v22 = vpop.trf.xlu1 }
 0x239   : > { %4017 = vmatprep.mubr.msk.f32.mxu0 %vm579_vm3, %v1219_v22 }
 0x23c   : > { %v1220_v23 = vpop.trf.xlu1 }
 0x23d   : > { %4018 = vmatmul.mubr.msk.f32.gmra.mrb[20].mxu0 %vm579_vm3, %v1220_v23 }
 0x240   : > { %v1221_v25 = vpop.trf.xlu1 }
 0x241   : > { %4020 = vmatprep.mubr.msk.f32.mxu0 %vm579_vm3, %v1221_v25 }
 0x244   : > { %v1222_v27 = vpop.trf.xlu1 }
 0x245   : > { %4021 = vmatmul.mubr.msk.f32.gmra.mrb[22].mxu0 %vm579_vm3, %v1222_v27 }
 0x248   : > { %v1223_v28 = vpop.trf.xlu1 }
 0x249   : > { %4023 = vmatprep.mubr.msk.f32.mxu0 %vm579_vm3, %v1223_v28 }
 0x24c   : > { %v1224_v30 = vpop.trf.xlu1 }
 0x24d   : > { %4024 = vmatmul.mubr.msk.f32.gmra.mrb[24].mxu0 %vm579_vm3, %v1224_v30 }
 0x24e   : > { %4042 = vmatprep.mubr.msk.f32.mxu0 %vm579_vm3, %v1543_v19 }
 0x250   : > { %v1706_v32 = vpop.trf.xlu1 }
 0x251   : > { %4043 = vmatmul.mubr.msk.f32.vlgmr.msra.gmra.mrb[26].mxu0 %vm579_vm3, %v1544_v21  ;;  %4056 = vmatprep.mubr.msk.f32.mxu1 %vm579_vm3, %v1706_v32 }
 0x252   : > { %4045 = vmatprep.mubr.msk.f32.mxu0 %vm579_vm3, %v1545_v24 }
 0x254   : > { %v1707_v34 = vpop.trf.xlu1 }
 0x255   : > { %4046 = vmatmul.mubr.msk.f32.gmra.mrb[28].mxu0 %vm579_vm3, %v1546_v26  ;;  %4057 = vmatmul.mubr.msk.f32.vlgmr.msra.gmra.mrb[34].mxu1 %vm579_vm3, %v1707_v34 }
 0x256   : > { %4048 = vmatprep.mubr.msk.f32.mxu0 %vm579_vm3, %v1547_v29 }
 0x258   : > { %v1708_v35 = vpop.trf.xlu1 }
 0x259   : > { %4049 = vmatmul.mubr.msk.f32.gmra.mrb[30].mxu0 %vm579_vm3, %v1548_v31  ;;  %4059 = vmatprep.mubr.msk.f32.mxu1 %vm579_vm3, %v1708_v35 }
 0x25a   : > { %4051 = vmatprep.mubr.msk.f32.mxu0 %vm579_vm3, %v1549_v33 }
 0x25c   : > { %v1709_v37 = vpop.trf.xlu1 }
 0x25d   : > { %4052 = vmatmul.mubr.msk.f32.gmra.mrb[32].mxu0 %vm579_vm3, %v1550_v36  ;;  %4060 = vmatmul.mubr.msk.f32.gmra.mrb[36].mxu1 %vm579_vm3, %v1709_v37 }
 0x260   : > { %v1710_v38 = vpop.trf.xlu1 }
 0x261   : > { %4062 = vmatprep.mubr.msk.f32.mxu1 %vm579_vm3, %v1710_v38 }
 0x264   : > { %v1711_v39 = vpop.trf.xlu1 }
 0x265   : > { %4063 = vmatmul.mubr.msk.f32.gmra.mrb[38].mxu1 %vm579_vm3, %v1711_v39 }
 0x268   : > { %v1712_v40 = vpop.trf.xlu1 }
 0x269   : > { %4065 = vmatprep.mubr.msk.f32.mxu1 %vm579_vm3, %v1712_v40 }
 0x26c   : > { %v1713_v41 = vpop.trf.xlu1 }
 0x26d   : > { %4066 = vmatmul.mubr.msk.f32.gmra.mrb[40].mxu1 %vm579_vm3, %v1713_v41 }
 0x288   : > { %v4900_v42 = vpop.f32.mrb[12].mxu0 }
 0x289   : > { %v1904_v43 = vsel %vm229_vm1, %v4900_v42, -inf  ;;  %v4904_v44 = vpop.f32.mrb[13].mxu0 }
 0x28a   : > { %1905 = vmax.xlane.f32.xlu0 %v1904_v43  ;;  %v1901_v53 = vsel %vm229_vm1, %v4904_v44, -inf }
 0x290   : > { %v4906_v45 = vpop.f32.mrb[14].mxu0 }
 0x291   : > { %v4908_v46 = vpop.f32.mrb[15].mxu0  ;;  %v1910_v54 = vsel %vm229_vm1, %v4906_v45, -inf }
 0x292   : > { %v1907_v55 = vsel %vm229_vm1, %v4908_v46, -inf }
 0x298   : > { %v4910_v47 = vpop.f32.mrb[16].mxu0 }
 0x299   : > { %v4912_v48 = vpop.f32.mrb[17].mxu0  ;;  %v1916_v60 = vsel %vm229_vm1, %v4910_v47, -inf }
 0x29a   : > { %v1913_v61 = vsel %vm229_vm1, %v4912_v48, -inf }
 0x2a8   : > { %v4914_v49 = vpop.f32.mrb[0].mxu1 }
 0x2a9   : > { %v4916_v50 = vpop.f32.mrb[1].mxu1  ;;  %v1856_v51 = vsel %vm229_vm1, %v4914_v49, -inf }
 0x2aa   : > { %1857 = vmax.xlane.f32.xlu1 %v1856_v51  ;;  %v1853_v52 = vsel %vm229_vm1, %v4916_v50, -inf }
 0x2ab   : > { %1854 = vmax.xlane.f32.xlu0 %v1853_v52 }
 0x2ae   : > { %1902 = vmax.xlane.f32.xlu1 %v1901_v53 }
 0x2af   : > { %1911 = vmax.xlane.f32.xlu0 %v1910_v54 }
 0x2b0   : > { %v4928_v56 = vpop.f32.mrb[2].mxu1 }
 0x2b1   : > { %v1862_v57 = vsel %vm229_vm1, %v4928_v56, -inf  ;;  %v4932_v58 = vpop.f32.mrb[3].mxu1 }
 0x2b2   : > { %1908 = vmax.xlane.f32.xlu1 %v1907_v55  ;;  %v1859_v59 = vsel %vm229_vm1, %v4932_v58, -inf }
 0x2b3   : > { %1863 = vmax.xlane.f32.xlu0 %v1862_v57 }
 0x2b6   : > { %1860 = vmax.xlane.f32.xlu1 %v1859_v59 }
 0x2b7   : > { %1917 = vmax.xlane.f32.xlu0 %v1916_v60 }
 0x2b8   : > { %v4940_v62 = vpop.f32.mrb[4].mxu1 }
 0x2b9   : > { %v1868_v1 = vsel %vm229_vm1, %v4940_v62, -inf  ;;  %v4944_v2 = vpop.f32.mrb[5].mxu1 }
 0x2ba   : > { %1914 = vmax.xlane.f32.xlu1 %v1913_v61  ;;  %v1865_v3 = vsel %vm229_vm1, %v4944_v2, -inf }
 0x2bb   : > { %1869 = vmax.xlane.f32.xlu0 %v1868_v1 }
 0x2be   : > { %1866 = vmax.xlane.f32.xlu1 %v1865_v3 }
 0x2c0   : > { %v4948_v4 = vpop.f32.mrb[6].mxu1 }
 0x2c1   : > { %v4950_v5 = vpop.f32.mrb[7].mxu1  ;;  %v1874_v43 = vsel %vm229_vm1, %v4948_v4, -inf }
 0x2c2   : > { %v1871_v51 = vsel %vm229_vm1, %v4950_v5, -inf }
 0x2c4   : > { %v4952_v6 = vpop.f32.mrb[8].mxu1 }
 0x2c5   : > { %v4954_v7 = vpop.f32.mrb[9].mxu1  ;;  %v1880_v57 = vsel %vm229_vm1, %v4952_v6, -inf }
 0x2c6   : > { %v1877_v59 = vsel %vm229_vm1, %v4954_v7, -inf }
 0x2c8   : > { %v4956_v9 = vpop.f32.mrb[10].mxu1 }
 0x2c9   : > { %v4958_v10 = vpop.f32.mrb[11].mxu1 }
 0x2cc   : > { %v4960_v11 = vpop.f32.mrb[12].mxu1 }
 0x2cd   : > { %v4962_v13 = vpop.f32.mrb[13].mxu1 }
 0x2d0   : > { %v4964_v14 = vpop.f32.mrb[14].mxu1 }
 0x2d1   : > { %v4966_v15 = vpop.f32.mrb[15].mxu1 }
 0x2d4   : > { %v4968_v16 = vpop.f32.mrb[16].mxu1 }
 0x2d5   : > { %v4970_v17 = vpop.f32.mrb[17].mxu1 }
 0x2d8   : > { %v4972_v18 = vpop.f32.mrb[18].mxu1 }
 0x2d9   : > { %v4974_v19 = vpop.f32.mrb[19].mxu1 }
 0x2dc   : > { %v4976_v20 = vpop.f32.mrb[20].mxu1 }
 0x2dd   : > { %v4978_v21 = vpop.f32.mrb[21].mxu1 }
 0x2e0   : > { %v4980_v22 = vpop.f32.mrb[22].mxu1 }
 0x2e1   : > { %5926 = vst [vmem:[#allocation6_spill] sm:$0xff] %v4980_v22  ;;  %v4982_v23 = vpop.f32.mrb[23].mxu1 }
 0x2e4   : > { %v4984_v24 = vpop.f32.mrb[24].mxu1 }
 0x2e5   : > { %5927 = vst [vmem:[#allocation7_spill] sm:$0xff] %v4984_v24  ;;  %v4986_v25 = vpop.f32.mrb[25].mxu1 }
 0x2e8   : > { %v4988_v26 = vpop.f32.mrb[26].mxu1 }
 0x2e9   : > { %5928 = vst [vmem:[#allocation8_spill] sm:$0xff] %v4988_v26  ;;  %v4990_v27 = vpop.f32.mrb[27].mxu1 }
 0x2ea   : > { %5929 = vst [vmem:[#allocation9_spill] sm:$0xff] %v4990_v27 }
 0x2ec   : > { %v4992_v28 = vpop.f32.mrb[28].mxu1 }
 0x2ed   : > { %5930 = vst [vmem:[#allocation10_spill] sm:$0xff] %v4992_v28  ;;  %v4994_v29 = vpop.f32.mrb[29].mxu1 }
 0x2f0   : > { %v4996_v30 = vpop.f32.mrb[30].mxu1 }
 0x2f1   : > { %5931 = vst [vmem:[#allocation11_spill] sm:$0xff] %v4996_v30  ;;  %v4998_v31 = vpop.f32.mrb[31].mxu1 }
 0x2f2   : > { %5932 = vst [vmem:[#allocation12_spill] sm:$0xff] %v4998_v31 }
 0x2f4   : > { %v5000_v32 = vpop.f32.mrb[32].mxu1 }
 0x2f5   : > { %v5002_v33 = vpop.f32.mrb[33].mxu1 }
 0x308   : > { %v5004_v34 = vpop.f32.mrb[18].mxu0 }
 0x309   : > { %v5006_v35 = vpop.f32.mrb[19].mxu0  ;;  %v1952_v36 = vsel %vm229_vm1, %v5004_v34, -inf }
 0x30a   : > { %1953 = vmax.xlane.f32.xlu0 %v1952_v36  ;;  %v1949_v37 = vsel %vm229_vm1, %v5006_v35, -inf }
 0x30b   : > { %1950 = vmax.xlane.f32.xlu1 %v1949_v37  ;;  %v1886_v37 = vsel %vm229_vm1, %v4956_v9, -inf }
 0x310   : > { %v5012_v38 = vpop.f32.mrb[20].mxu0 }
 0x311   : > { %v5014_v39 = vpop.f32.mrb[21].mxu0  ;;  %v1958_v40 = vsel %vm229_vm1, %v5012_v38, -inf }
 0x312   : > { %1959 = vmax.xlane.f32.xlu0 %v1958_v40  ;;  %v1955_v41 = vsel %vm229_vm1, %v5014_v39, -inf }
 0x313   : > { %1956 = vmax.xlane.f32.xlu1 %v1955_v41  ;;  %v1883_v41 = vsel %vm229_vm1, %v4958_v10, -inf }
 0x316   : > { %1875 = vmax.xlane.f32.xlu0 %v1874_v43 }
 0x317   : > { %1872 = vmax.xlane.f32.xlu1 %v1871_v51 }
 0x318   : > { %v5024_v52 = vpop.f32.mrb[22].mxu0 }
 0x319   : > { %v5026_v53 = vpop.f32.mrb[23].mxu0  ;;  %v1964_v54 = vsel %vm229_vm1, %v5024_v52, -inf }
 0x31a   : > { %1965 = vmax.xlane.f32.xlu0 %v1964_v54  ;;  %v1961_v55 = vsel %vm229_vm1, %v5026_v53, -inf }
 0x31b   : > { %1962 = vmax.xlane.f32.xlu1 %v1961_v55 }
 0x31e   : > { %1881 = vmax.xlane.f32.xlu0 %v1880_v57 }
 0x31f   : > { %1878 = vmax.xlane.f32.xlu1 %v1877_v59 }
 0x320   : > { %v5036_v60 = vpop.f32.mrb[24].mxu0 }
 0x321   : > { %5933 = vst [vmem:[#allocation13_spill] sm:$0xff] %v5036_v60  ;;  %v5038_v61 = vpop.f32.mrb[25].mxu0  ;;  %v1970_v1 = vsel %vm229_vm1, %v5036_v60, -inf }
 0x322   : > { %1971 = vmax.xlane.f32.xlu0 %v1970_v1  ;;  %v1967_v3 = vsel %vm229_vm1, %v5038_v61, -inf }
 0x323   : > { %1968 = vmax.xlane.f32.xlu1 %v1967_v3  ;;  %v1892_v3 = vsel %vm229_vm1, %v4960_v11, -inf }
 0x324   : > { %v5044_v36 = vpop.f32.mrb[26].mxu0 }
 0x325   : > { %5934 = vst [vmem:[#allocation14_spill] sm:$0xff] %v5044_v36  ;;  %v5048_v40 = vpop.f32.mrb[27].mxu0  ;;  %v2000_v43 = vsel %vm229_vm1, %v5044_v36, -inf }
 0x326   : > { %1887 = vmax.xlane.f32.xlu0 %v1886_v37  ;;  %v1997_v51 = vsel %vm229_vm1, %v5048_v40, -inf }
 0x327   : > { %1884 = vmax.xlane.f32.xlu1 %v1883_v41  ;;  %v1889_v41 = vsel %vm229_vm1, %v4962_v13, -inf }
 0x328   : > { %v5056_v54 = vpop.f32.mrb[28].mxu0  ;;  %v5058_v55 = vpop.f32.mrb[34].mxu1 }
 0x329   : > { %5935 = vst [vmem:[#allocation15_spill] sm:$0xff] %v5056_v54  ;;  %5936 = vst [vmem:[#allocation16_spill] sm:$0xff] %v5058_v55  ;;  %v5060_v57 = vpop.f32.mrb[29].mxu0  ;;  %v5062_v59 = vpop.f32.mrb[35].mxu1  ;;  %v2006_v8 = vsel %vm229_vm1, %v5056_v54, -inf }
 0x32a   : > { %5937 = vst [vmem:[#allocation17_spill] sm:$0xff] %v5060_v57  ;;  %2001 = vmax.xlane.f32.xlu0 %v2000_v43  ;;  %v2003_v12 = vsel %vm229_vm1, %v5060_v57, -inf }
 0x32b   : > { %1998 = vmax.xlane.f32.xlu1 %v1997_v51 }
 0x32c   : > { %v5064_v1 = vpop.f32.mrb[30].mxu0 }
 0x32d   : > { %5938 = vst [vmem:[#allocation18_spill] sm:$0xff] %v5064_v1  ;;  %v5068_v37 = vpop.f32.mrb[31].mxu0  ;;  %v2012_v54 = vsel %vm229_vm1, %v5064_v1, -inf }
 0x32e   : > { %5939 = vst [vmem:[#allocation19_spill] sm:$0xff] %v5068_v37  ;;  %1893 = vmax.xlane.f32.xlu0 %v1892_v3  ;;  %v1898_v3 = vsel %vm229_vm1, %v4964_v14, -inf  ;;  %v2009_v57 = vsel %vm229_vm1, %v5068_v37, -inf }
 0x32f   : > { %1890 = vmax.xlane.f32.xlu1 %v1889_v41  ;;  %v1895_v41 = vsel %vm229_vm1, %v4966_v15, -inf }
 0x330   : > { %v5076_v43 = vpop.f32.mrb[32].mxu0  ;;  %v5078_v51 = vpop.f32.mrb[36].mxu1 }
 0x331   : > { %5940 = vst [vmem:[#allocation20_spill] sm:$0xff] %v5076_v43  ;;  %v5080_v63 = vpop.f32.mrb[33].mxu0  ;;  %v5082_v0 = vpop.f32.mrb[37].mxu1 }
 0x332   : > { %2007 = vmax.xlane.f32.xlu0 %v2006_v8  ;;  %v1922_v8 = vsel %vm229_vm1, %v4968_v16, -inf }
 0x333   : > { %2004 = vmax.xlane.f32.xlu1 %v2003_v12  ;;  %v1919_v12 = vsel %vm229_vm1, %v4970_v17, -inf }
 0x336   : > { %1899 = vmax.xlane.f32.xlu0 %v1898_v3  ;;  %v2018_v3 = vsel %vm229_vm1, %v5076_v43, -inf }
 0x337   : > { %1896 = vmax.xlane.f32.xlu1 %v1895_v41  ;;  %v2015_v41 = vsel %vm229_vm1, %v5080_v63, -inf }
 0x338   : > { %v5092_v36 = vpop.f32.mrb[38].mxu1 }
 0x339   : > { %v5094_v60 = vpop.f32.mrb[39].mxu1 }
 0x33a   : > { %2013 = vmax.xlane.f32.xlu0 %v2012_v54  ;;  %v1928_v54 = vsel %vm229_vm1, %v4972_v18, -inf }
 0x33b   : > { %2010 = vmax.xlane.f32.xlu1 %v2009_v57  ;;  %v1925_v57 = vsel %vm229_vm1, %v4974_v19, -inf }
 0x33e   : > { %1923 = vmax.xlane.f32.xlu0 %v1922_v8  ;;  %v1934_v8 = vsel %vm229_vm1, %v4976_v20, -inf }
 0x33f   : > { %1920 = vmax.xlane.f32.xlu1 %v1919_v12  ;;  %v1931_v12 = vsel %vm229_vm1, %v4978_v21, -inf }
 0x340   : > { %v5104_v1 = vpop.f32.mrb[40].mxu1 }
 0x341   : > { %v5106_v37 = vpop.f32.mrb[41].mxu1 }
 0x342   : > { %2019 = vmax.xlane.f32.xlu0 %v2018_v3  ;;  %v1940_v3 = vsel %vm229_vm1, %v4980_v22, -inf  ;;  %v1976_v22 = vsel %vm229_vm1, %v4988_v26, -inf }
 0x343   : > { %2016 = vmax.xlane.f32.xlu1 %v2015_v41  ;;  %v1937_v41 = vsel %vm229_vm1, %v4982_v23, -inf }
 0x346   : > { %1929 = vmax.xlane.f32.xlu0 %v1928_v54  ;;  %v5120_v54 = vpop.permute.xlu1 %339 }
 0x347   : > { %1926 = vmax.xlane.f32.xlu1 %v1925_v57  ;;  %5941 = vst [vmem:[#allocation21_spill] sm:$0xff] %v5120_v54  ;;  %v1946_v57 = vsel %vm229_vm1, %v4984_v24, -inf  ;;  %v1982_v54 = vsel %vm229_vm1, %v4992_v28, -inf }
 0x34a   : > { %1935 = vmax.xlane.f32.xlu0 %v1934_v8  ;;  %v1943_v8 = vsel %vm229_vm1, %v4986_v25, -inf  ;;  %v1858_v43 = vpop.xlane.xlu1 %1857 }
 0x34b   : > { %1932 = vmax.xlane.f32.xlu1 %v1931_v12  ;;  %v1906_v12 = vpop.xlane.xlu0 %1905 }
 0x34e   : > { %1941 = vmax.xlane.f32.xlu0 %v1940_v3  ;;  %v1973_v3 = vsel %vm229_vm1, %v4990_v27, -inf  ;;  %v1903_v24 = vpop.xlane.xlu1 %1902 }
 0x34f   : > { %1938 = vmax.xlane.f32.xlu1 %v1937_v41  ;;  %v1855_v41 = vpop.xlane.xlu0 %1854  ;;  %v2061_v28 = vsub.f32 %v4904_v44, %v1903_v24 }
 0x351   : > { %v2141_v44 = vmul.f32 1.442695, %v2061_v28  ;;  %v2036_v28 = vsel %vm229_vm1, %v5092_v36, -inf }
 0x352   : > { %1947 = vmax.xlane.f32.xlu0 %v1946_v57  ;;  %v1979_v57 = vsel %vm229_vm1, %v4994_v29, -inf  ;;  %v1909_v27 = vpop.xlane.xlu1 %1908 }
 0x353   : > { %1944 = vmax.xlane.f32.xlu1 %v1943_v8  ;;  %v1988_v8 = vsel %vm229_vm1, %v4996_v30, -inf  ;;  %v1912_v26 = vpop.xlane.xlu0 %1911 }
 0x356   : > { %1977 = vmax.xlane.f32.xlu0 %v1976_v22  ;;  %v1985_v22 = vsel %vm229_vm1, %v4998_v31, -inf  ;;  %v2046_v31 = vsub.f32 %v4914_v49, %v1858_v43  ;;  %v2027_v49 = vsel %vm229_vm1, %v5082_v0, -inf }
 0x357   : > { %1974 = vmax.xlane.f32.xlu1 %v1973_v3  ;;  %v2062_v3 = vsub.f32 %v4900_v42, %v1906_v12  ;;  %v2021_v42 = vsel %vm229_vm1, %v5062_v59, -inf  ;;  %v2045_v12 = vsub.f32 %v4916_v50, %v1855_v41  ;;  %v1864_v24 = vpop.xlane.xlu0 %1863 }
 0x359   : > { %v2143_v30 = vmul.f32 1.442695, %v2062_v3  ;;  %v2109_v43 = vmul.f32 1.442695, %v2045_v12  ;;  %v2063_v3 = vsub.f32 %v4908_v46, %v1909_v27  ;;  %v2042_v46 = vsel %vm229_vm1, %v5104_v1, -inf }
 0x35a   : > { %1983 = vmax.xlane.f32.xlu0 %v1982_v54  ;;  %v1994_v54 = vsel %vm229_vm1, %v5000_v32, -inf }
 0x35b   : > { %1980 = vmax.xlane.f32.xlu1 %v1979_v57  ;;  %v1991_v57 = vsel %vm229_vm1, %v5002_v33, -inf  ;;  %4396 = vpow2.f32 %v2143_v30  ;;  %v1918_v50 = vpop.xlane.xlu0 %1917  ;;  %v2048_v30 = vsub.f32 %v4928_v56, %v1864_v24  ;;  %v2039_v56 = vsel %vm229_vm1, %v5106_v37, -inf }
 0x35c   : > { %4398 = vpow2.f32 %v2141_v44 }
 0x35d   : > { %v2115_v27 = vmul.f32 1.442695, %v2048_v30 }
 0x35e   : > { %1989 = vmax.xlane.f32.xlu0 %v1988_v8  ;;  %v2024_v8 = vsel %vm229_vm1, %v5058_v55, -inf  ;;  %v2064_v55 = vsub.f32 %v4906_v45, %v1912_v26  ;;  %v2033_v45 = vsel %vm229_vm1, %v5094_v60, -inf  ;;  %v2145_v26 = vmul.f32 1.442695, %v2063_v3 }
 0x35f   : > { %1986 = vmax.xlane.f32.xlu1 %v1985_v22  ;;  %v1861_v22 = vpop.xlane.xlu1 %1860  ;;  %v1870_v44 = vpop.xlane.xlu0 %1869 }
 0x360   : > { %v2147_v41 = vmul.f32 1.442695, %v2064_v55 }
 0x362   : > { %1995 = vmax.xlane.f32.xlu0 %v1994_v54  ;;  %v2030_v54 = vsel %vm229_vm1, %v5078_v51, -inf }
 0x363   : > { %1992 = vmax.xlane.f32.xlu1 %v1991_v57  ;;  %v2111_v57 = vmul.f32 1.442695, %v2046_v31  ;;  %v1915_v31 = vpop.xlane.xlu1 %1914 }
 0x364   : > { %v2065_v12 = vsub.f32 %v4912_v48, %v1915_v31 }
 0x365   : > { %4400 = vpow2.f32 %v2111_v57  ;;  %v5168_v24 = vpop.eup %4396  ;;  %v2050_v57 = vsub.f32 %v4940_v62, %v1870_v44 }
 0x366   : > { %2025 = vmax.xlane.f32.xlu0 %v2024_v8  ;;  %4402 = vpow2.f32 %v2109_v43  ;;  %v2047_v8 = vsub.f32 %v4932_v58, %v1861_v22  ;;  %v5170_v22 = vpop.eup %4398  ;;  %v2288_v43 = vsel %vm229_vm1, %v5168_v24, 0.0 }
 0x367   : > { %2022 = vmax.xlane.f32.xlu1 %v2021_v42  ;;  %4404 = vpow2.f32 %v2147_v41  ;;  %v2066_v42 = vsub.f32 %v4910_v47, %v1918_v50  ;;  %v1867_v58 = vpop.xlane.xlu1 %1866  ;;  %v2149_v47 = vmul.f32 1.442695, %v2065_v12  ;;  %v2285_v3 = vsel %vm229_vm1, %v5170_v22, 0.0 }
 0x368   : > { %4406 = vpow2.f32 %v2145_v26  ;;  %v2113_v55 = vmul.f32 1.442695, %v2047_v8 }
 0x369   : > { %4408 = vpow2.f32 %v2115_v27 }
 0x36a   : > { %2031 = vmax.xlane.f32.xlu0 %v2030_v54  ;;  %v2151_v54 = vmul.f32 1.442695, %v2066_v42  ;;  %4410 = vpow2.f32 %v2113_v55 }
 0x36b   : > { %2028 = vmax.xlane.f32.xlu1 %v2027_v49  ;;  %v2049_v49 = vsub.f32 %v4944_v2, %v1867_v58 }
 0x36c   : > { %4412 = vpow2.f32 %v2151_v54 }
 0x36d   : > { %4414 = vpow2.f32 %v2149_v47  ;;  %v2117_v62 = vmul.f32 1.442695, %v2049_v49 }
 0x36e   : > { %2037 = vmax.xlane.f32.xlu0 %v2036_v28  ;;  %v2119_v28 = vmul.f32 1.442695, %v2050_v57 }
 0x36f   : > { %2034 = vmax.xlane.f32.xlu1 %v2033_v45  ;;  %v5176_v48 = vpop.eup %4400 }
 0x370   : > { %v5180_v50 = vpop.eup %4402  ;;  %v2240_v41 = vsel %vm229_vm1, %v5176_v48, 0.0  ;;  %4416 = vpow2.f32 %v2119_v28 }
 0x371   : > { %v5184_v2 = vpop.eup %4404  ;;  %v2237_v30 = vsel %vm229_vm1, %v5180_v50, 0.0  ;;  %4418 = vpow2.f32 %v2117_v62  ;;  %v5897_v62 = vmov 0.0|0.0  }
 0x372   : > { %2043 = vmax.xlane.f32.xlu0 %v2042_v46  ;;  %v5188_v31 = vpop.eup %4406  ;;  %v2294_v45 = vsel %vm229_vm1, %v5184_v2, 0.0  ;;  %4242 = vmatprep.subr.bf16.mxu0 %v5897_v62 }
 0x373   : > { %2040 = vmax.xlane.f32.xlu1 %v2039_v56  ;;  %v5192_v26 = vpop.eup %4408  ;;  %v2291_v8 = vsel %vm229_vm1, %v5188_v31, 0.0  ;;  %4258 = vmatprep.subr.bf16.mxu1 %v5897_v62 }
 0x374   : > { %v5196_v46 = vpop.eup %4410  ;;  %v2246_v27 = vsel %vm229_vm1, %v5192_v26, 0.0 }
 0x375   : > { %v2243_v56 = vsel %vm229_vm1, %v5196_v46, 0.0 }
 0x376   : > { %2289 = vadd.xlane.f32.xlu0 %v2288_v43  ;;  %v5200_v42 = vpop.eup %4412 }
 0x377   : > { %2286 = vadd.xlane.f32.xlu1 %v2285_v3  ;;  %v5204_v55 = vpop.eup %4414  ;;  %v2300_v12 = vsel %vm229_vm1, %v5200_v42, 0.0 }
 0x378   : > { %v2297_v58 = vsel %vm229_vm1, %v5204_v55, 0.0 }
 0x37a   : > { %2241 = vadd.xlane.f32.xlu0 %v2240_v41  ;;  %v5208_v44 = vpop.eup %4416 }
 0x37b   : > { %2238 = vadd.xlane.f32.xlu1 %v2237_v30  ;;  %v5212_v54 = vpop.eup %4418  ;;  %v2252_v57 = vsel %vm229_vm1, %v5208_v44, 0.0 }
 0x37c   : > { %v2249_v47 = vsel %vm229_vm1, %v5212_v54, 0.0 }
 0x37e   : > { %2295 = vadd.xlane.f32.xlu0 %v2294_v45 }
 0x37f   : > { %2292 = vadd.xlane.f32.xlu1 %v2291_v8 }
 0x382   : > { %2247 = vadd.xlane.f32.xlu0 %v2246_v27 }
 0x383   : > { %2244 = vadd.xlane.f32.xlu1 %v2243_v56 }
 0x386   : > { %2301 = vadd.xlane.f32.xlu0 %v2300_v12 }
 0x387   : > { %2298 = vadd.xlane.f32.xlu1 %v2297_v58 }
 0x38a   : > { %2253 = vadd.xlane.f32.xlu0 %v2252_v57 }
 0x38b   : > { %2250 = vadd.xlane.f32.xlu1 %v2249_v47 }
 0x397   : > { %v1954_v49 = vpop.xlane.xlu0 %1953 }
 0x398   : > { %v2078_v43 = vsub.f32 %v5004_v34, %v1954_v49  ;;  %v1951_v3 = vpop.xlane.xlu1 %1950 }
 0x399   : > { %v2077_v28 = vsub.f32 %v5006_v35, %v1951_v3 }
 0x39a   : > { %v2175_v41 = vmul.f32 1.442695, %v2078_v43 }
 0x39b   : > { %v2173_v30 = vmul.f32 1.442695, %v2077_v28 }
 0x39c   : > { %4420 = vpow2.f32 %v2175_v41 }
 0x39d   : > { %4422 = vpow2.f32 %v2173_v30 }
 0x39f   : > { %v1960_v45 = vpop.xlane.xlu0 %1959 }
 0x3a0   : > { %v2080_v8 = vsub.f32 %v5012_v38, %v1960_v45  ;;  %v1957_v27 = vpop.xlane.xlu1 %1956 }
 0x3a1   : > { %v2079_v12 = vsub.f32 %v5014_v39, %v1957_v27 }
 0x3a2   : > { %v2179_v56 = vmul.f32 1.442695, %v2080_v8 }
 0x3a3   : > { %v1876_v34 = vpop.xlane.xlu0 %1875  ;;  %v2177_v49 = vmul.f32 1.442695, %v2079_v12 }
 0x3a4   : > { %4424 = vpow2.f32 %v2179_v56  ;;  %v2052_v35 = vsub.f32 %v4948_v4, %v1876_v34  ;;  %v1873_v58 = vpop.xlane.xlu1 %1872 }
 0x3a5   : > { %v2051_v57 = vsub.f32 %v4950_v5, %v1873_v58 }
 0x3a6   : > { %v5226_v47 = vpop.eup %4420  ;;  %v2123_v43 = vmul.f32 1.442695, %v2052_v35 }
 0x3a7   : > { %5942 = vst [vmem:[#allocation22_spill] sm:$0xff] %v5226_v47  ;;  %v5228_v3 = vpop.eup %4422  ;;  %v2121_v28 = vmul.f32 1.442695, %v2051_v57  ;;  %v1966_v41 = vpop.xlane.xlu0 %1965  ;;  %v2336_v38 = vsel %vm229_vm1, %v5226_v47, 0.0 }
 0x3a8   : > { %5943 = vst [vmem:[#allocation23_spill] sm:$0xff] %v5228_v3  ;;  %4426 = vpow2.f32 %v2123_v43  ;;  %v2082_v39 = vsub.f32 %v5024_v52, %v1966_v41  ;;  %v1963_v30 = vpop.xlane.xlu1 %1962  ;;  %2337 = vadd.xlane.f32.xlu0 %v2336_v38  ;;  %v2333_v4 = vsel %vm229_vm1, %v5228_v3, 0.0 }
 0x3a9   : > { %4428 = vpow2.f32 %v2121_v28  ;;  %2334 = vadd.xlane.f32.xlu1 %v2333_v4  ;;  %v2081_v52 = vsub.f32 %v5026_v53, %v1963_v30 }
 0x3aa   : > { %4430 = vpow2.f32 %v2177_v49  ;;  %v2183_v5 = vmul.f32 1.442695, %v2082_v39 }
 0x3ab   : > { %v1882_v45 = vpop.xlane.xlu0 %1881  ;;  %v2181_v43 = vmul.f32 1.442695, %v2081_v52 }
 0x3ac   : > { %v2054_v8 = vsub.f32 %v4952_v6, %v1882_v45  ;;  %v1879_v27 = vpop.xlane.xlu1 %1878  ;;  %4432 = vpow2.f32 %v2183_v5 }
 0x3ad   : > { %v2053_v56 = vsub.f32 %v4954_v7, %v1879_v27 }
 0x3ae   : > { %v5237_v12 = vpop.eup %4424  ;;  %v2127_v34 = vmul.f32 1.442695, %v2054_v8 }
 0x3af   : > { %5944 = vst [vmem:[#allocation24_spill] sm:$0xff] %v5237_v12  ;;  %v2125_v35 = vmul.f32 1.442695, %v2053_v56  ;;  %v5240_v58 = vpop.xlane.xlu0 %1971  ;;  %v2342_v57 = vsel %vm229_vm1, %v5237_v12, 0.0 }
 0x3b0   : > { %v5244_v49 = vpop.xlane.xlu1 %1968  ;;  %2343 = vadd.xlane.f32.xlu0 %v2342_v57 }
 0x3b1   : > { %4434 = vpow2.f32 %v2125_v35 }
 0x3b2   : > { %v5246_v6 = vpop.eup %4426  ;;  %4436 = vpow2.f32 %v2127_v34 }
 0x3b3   : > { %v5248_v7 = vpop.eup %4428  ;;  %v1888_v28 = vpop.xlane.xlu0 %1887  ;;  %v2258_v53 = vsel %vm229_vm1, %v5246_v6, 0.0  ;;  %4438 = vpow2.f32 %v2181_v43 }
 0x3b4   : > { %v5252_v41 = vpop.eup %4430  ;;  %v2056_v38 = vsub.f32 %v4956_v9, %v1888_v28  ;;  %v1885_v39 = vpop.xlane.xlu1 %1884  ;;  %2259 = vadd.xlane.f32.xlu0 %v2258_v53  ;;  %v2255_v30 = vsel %vm229_vm1, %v5248_v7, 0.0 }
 0x3b5   : > { %5945 = vst [vmem:[#allocation25_spill] sm:$0xff] %v5252_v41  ;;  %v2055_v4 = vsub.f32 %v4958_v10, %v1885_v39  ;;  %2256 = vadd.xlane.f32.xlu1 %v2255_v30  ;;  %v2339_v27 = vsel %vm229_vm1, %v5252_v41, 0.0 }
 0x3b6   : > { %v2131_v5 = vmul.f32 1.442695, %v2056_v38  ;;  %v5262_v56 = vpop.eup %4432 }
 0x3b7   : > { %v2129_v45 = vmul.f32 1.442695, %v2055_v4  ;;  %v5258_v8 = vpop.xlane.xlu0 %2001  ;;  %5946 = vst [vmem:[#allocation26_spill] sm:$0xff] %v5262_v56  ;;  %v2348_v35 = vsel %vm229_vm1, %v5262_v56, 0.0 }
 0x3b8   : > { %v5264_v52 = vpop.xlane.xlu1 %1998  ;;  %2340 = vadd.xlane.f32.xlu0 %v2339_v27 }
 0x3b9   : > { %4440 = vpow2.f32 %v2129_v45 }
 0x3ba   : > { %4442 = vpow2.f32 %v2131_v5 }
 0x3bb   : > { %v5268_v10 = vpop.eup %4434  ;;  %v1894_v34 = vpop.xlane.xlu0 %1893 }
 0x3bc   : > { %v5272_v57 = vpop.eup %4436  ;;  %v2058_v43 = vsub.f32 %v4960_v11, %v1894_v34  ;;  %v1891_v28 = vpop.xlane.xlu1 %1890  ;;  %2349 = vadd.xlane.f32.xlu0 %v2348_v35  ;;  %v2261_v53 = vsel %vm229_vm1, %v5268_v10, 0.0 }
 0x3bd   : > { %v2057_v38 = vsub.f32 %v4962_v13, %v1891_v28  ;;  %2262 = vadd.xlane.f32.xlu1 %v2261_v53  ;;  %v2264_v5 = vsel %vm229_vm1, %v5272_v57, 0.0  ;;  %v5282_v45 = vpop.eup %4438 }
 0x3be   : > { %v2135_v39 = vmul.f32 1.442695, %v2058_v43  ;;  %5947 = vst [vmem:[#allocation27_spill] sm:$0xff] %v5282_v45  ;;  %v2345_v13 = vsel %vm229_vm1, %v5282_v45, 0.0 }
 0x3bf   : > { %v2133_v30 = vmul.f32 1.442695, %v2057_v38  ;;  %v5278_v4 = vpop.xlane.xlu0 %2007 }
 0x3c0   : > { %4444 = vpow2.f32 %v2135_v39  ;;  %v5284_v27 = vpop.xlane.xlu1 %2004  ;;  %2265 = vadd.xlane.f32.xlu0 %v2264_v5 }
 0x3c1   : > { %4446 = vpow2.f32 %v2133_v30 }
 0x3c3   : > { %v5286_v11 = vpop.eup %4440  ;;  %v1900_v34 = vpop.xlane.xlu0 %1899 }
 0x3c4   : > { %v5290_v35 = vpop.eup %4442  ;;  %v2060_v43 = vsub.f32 %v4964_v14, %v1900_v34  ;;  %v1897_v28 = vpop.xlane.xlu1 %1896  ;;  %2346 = vadd.xlane.f32.xlu0 %v2345_v13  ;;  %v2267_v53 = vsel %vm229_vm1, %v5286_v11, 0.0 }
 0x3c5   : > { %v2059_v38 = vsub.f32 %v4966_v15, %v1897_v28  ;;  %2268 = vadd.xlane.f32.xlu1 %v2267_v53  ;;  %v2270_v62 = vsel %vm229_vm1, %v5290_v35, 0.0 }
 0x3c6   : > { %v2139_v39 = vmul.f32 1.442695, %v2060_v43 }
 0x3c7   : > { %v2137_v30 = vmul.f32 1.442695, %v2059_v38  ;;  %v5296_v5 = vpop.xlane.xlu0 %2013 }
 0x3c8   : > { %4448 = vpow2.f32 %v2139_v39  ;;  %v5300_v9 = vpop.xlane.xlu1 %2010  ;;  %2271 = vadd.xlane.f32.xlu0 %v2270_v62 }
 0x3c9   : > { %4450 = vpow2.f32 %v2137_v30 }
 0x3ca   : > { %v5302_v14 = vpop.eup %4444 }
 0x3cb   : > { %v5304_v34 = vpop.eup %4446  ;;  %v1924_v13 = vpop.xlane.xlu0 %1923  ;;  %v2276_v15 = vsel %vm229_vm1, %v5302_v14, 0.0 }
 0x3cc   : > { %v2068_v43 = vsub.f32 %v4968_v16, %v1924_v13  ;;  %v1921_v28 = vpop.xlane.xlu1 %1920  ;;  %2277 = vadd.xlane.f32.xlu0 %v2276_v15  ;;  %v2273_v53 = vsel %vm229_vm1, %v5304_v34, 0.0 }
 0x3cd   : > { %v2067_v38 = vsub.f32 %v4970_v17, %v1921_v28  ;;  %2274 = vadd.xlane.f32.xlu1 %v2273_v53 }
 0x3ce   : > { %v2155_v62 = vmul.f32 1.442695, %v2068_v43 }
 0x3cf   : > { %v2153_v39 = vmul.f32 1.442695, %v2067_v38  ;;  %v5312_v30 = vpop.xlane.xlu0 %2019 }
 0x3d0   : > { %4452 = vpow2.f32 %v2155_v62  ;;  %v5314_v56 = vpop.xlane.xlu1 %2016 }
 0x3d1   : > { %4454 = vpow2.f32 %v2153_v39 }
 0x3d2   : > { %v5318_v12 = vpop.eup %4448 }
 0x3d3   : > { %5948 = vst [vmem:[#allocation28_spill] sm:$0xff] %v5318_v12  ;;  %v5320_v16 = vpop.eup %4450  ;;  %v1930_v13 = vpop.xlane.xlu0 %1929  ;;  %v2282_v17 = vsel %vm229_vm1, %v5318_v12, 0.0 }
 0x3d4   : > { %5949 = vst [vmem:[#allocation29_spill] sm:$0xff] %v5320_v16  ;;  %v2070_v15 = vsub.f32 %v4972_v18, %v1930_v13  ;;  %v1927_v43 = vpop.xlane.xlu1 %1926  ;;  %2283 = vadd.xlane.f32.xlu0 %v2282_v17  ;;  %v2279_v28 = vsel %vm229_vm1, %v5320_v16, 0.0  ;;  %v2083_v18 = vsub.f32 %v5038_v61, %v5244_v49  ;;  %v5905_v17 = vmov 0.0  }
 0x3d5   : > { %v2069_v53 = vsub.f32 %v4974_v19, %v1927_v43  ;;  %2280 = vadd.xlane.f32.xlu1 %v2279_v28  ;;  %4084 = vmatprep.mubr.msk.f32.mxu0 %vm4662_vm4, %v5905_v17  ;;  %v5953_v43 = vld [vmem:[#allocation13_spill] sm:$0xff] }
 0x3d6   : > { %v2159_v38 = vmul.f32 1.442695, %v2070_v15  ;;  %4103 = vmatprep.mubr.msk.f32.mxu1 %vm4662_vm4, %v5905_v17  ;;  %v2084_v28 = vsub.f32 %v5953_v43, %v5240_v58 }
 0x3d7   : > { %v2157_v62 = vmul.f32 1.442695, %v2069_v53  ;;  %v1936_v45 = vpop.xlane.xlu0 %1935  ;;  %v2185_v53 = vmul.f32 1.442695, %v2083_v18 }
 0x3d8   : > { %4456 = vpow2.f32 %v2159_v38  ;;  %v2072_v39 = vsub.f32 %v4976_v20, %v1936_v45  ;;  %v1933_v41 = vpop.xlane.xlu1 %1932 }
 0x3d9   : > { %4458 = vpow2.f32 %v2157_v62  ;;  %v2071_v3 = vsub.f32 %v4978_v21, %v1933_v41  ;;  %v5952_v41 = vld [vmem:[#allocation6_spill] sm:$0xff] }
 0x3da   : > { %v5330_v47 = vpop.eup %4452  ;;  %v2163_v13 = vmul.f32 1.442695, %v2072_v39 }
 0x3db   : > { %5950 = vst [vmem:[#allocation30_spill] sm:$0xff] %v5330_v47  ;;  %v2161_v19 = vmul.f32 1.442695, %v2071_v3  ;;  %v1942_v20 = vpop.xlane.xlu0 %1941  ;;  %v2306_v45 = vsel %vm229_vm1, %v5330_v47, 0.0  ;;  %v5340_v21 = vpop.eup %4454 }
 0x3dc   : > { %5951 = vst [vmem:[#allocation31_spill] sm:$0xff] %v5340_v21  ;;  %4460 = vpow2.f32 %v2163_v13  ;;  %v2074_v15 = vsub.f32 %v5952_v41, %v1942_v20  ;;  %v1939_v61 = vpop.xlane.xlu1 %1938  ;;  %2307 = vadd.xlane.f32.xlu0 %v2306_v45  ;;  %v2303_v39 = vsel %vm229_vm1, %v5340_v21, 0.0 }
 0x3dd   : > { %4462 = vpow2.f32 %v2161_v19  ;;  %v2073_v49 = vsub.f32 %v4982_v23, %v1939_v61  ;;  %v2187_v19 = vmul.f32 1.442695, %v2084_v28  ;;  %v5955_v23 = vld [vmem:[#allocation14_spill] sm:$0xff] }
 0x3de   : > { %v2167_v38 = vmul.f32 1.442695, %v2074_v15  ;;  %v2094_v58 = vsub.f32 %v5955_v23, %v5258_v8  ;;  %v5958_v8 = vld [vmem:[#allocation17_spill] sm:$0xff] }
 0x3df   : > { %v2165_v3 = vmul.f32 1.442695, %v2073_v49  ;;  %v5346_v62 = vpop.xlane.xlu0 %1947  ;;  %v2095_v28 = vsub.f32 %v5958_v8, %v5284_v27 }
 0x3e0   : > { %4464 = vpow2.f32 %v2167_v38  ;;  %v5350_v13 = vpop.xlane.xlu1 %1944  ;;  %2304 = vadd.xlane.f32.xlu0 %v2303_v39  ;;  %v2207_v43 = vmul.f32 1.442695, %v2094_v58 }
 0x3e1   : > { %4466 = vpow2.f32 %v2165_v3  ;;  %v2209_v58 = vmul.f32 1.442695, %v2095_v28 }
 0x3e2   : > { %v5352_v20 = vpop.eup %4456  ;;  %4468 = vpow2.f32 %v2185_v53 }
 0x3e3   : > { %5954 = vst [vmem:[#allocation6_spill] sm:$0xff] %v5352_v20  ;;  %v5356_v18 = vpop.eup %4458  ;;  %v5358_v45 = vpop.xlane.xlu0 %1977  ;;  %v2312_v41 = vsel %vm229_vm1, %v5352_v20, 0.0  ;;  %4470 = vpow2.f32 %v2187_v19  ;;  %v5961_v19 = vld [vmem:[#allocation15_spill] sm:$0xff] }
 0x3e4   : > { %5956 = vst [vmem:[#allocation13_spill] sm:$0xff] %v5356_v18  ;;  %v5362_v15 = vpop.xlane.xlu1 %1974  ;;  %2313 = vadd.xlane.f32.xlu0 %v2312_v41  ;;  %v2309_v61 = vsel %vm229_vm1, %v5356_v18, 0.0  ;;  %4472 = vpow2.f32 %v2207_v43  ;;  %v2096_v27 = vsub.f32 %v5961_v19, %v5278_v4  ;;  %v5964_v4 = vld [vmem:[#allocation19_spill] sm:$0xff] }
 0x3e5   : > { %2310 = vadd.xlane.f32.xlu1 %v2309_v61  ;;  %4474 = vpow2.f32 %v2209_v58  ;;  %v2097_v28 = vsub.f32 %v5964_v4, %v5300_v9  ;;  %v5968_v20 = vld [vmem:[#allocation7_spill] sm:$0xff] }
 0x3e6   : > { %v5366_v49 = vpop.eup %4460  ;;  %v2211_v43 = vmul.f32 1.442695, %v2096_v27 }
 0x3e7   : > { %5957 = vst [vmem:[#allocation14_spill] sm:$0xff] %v5366_v49  ;;  %v5370_v53 = vpop.eup %4462  ;;  %v5372_v38 = vpop.xlane.xlu0 %1983  ;;  %v2318_v3 = vsel %vm229_vm1, %v5366_v49, 0.0 }
 0x3e8   : > { %5959 = vst [vmem:[#allocation17_spill] sm:$0xff] %v5370_v53  ;;  %v5376_v39 = vpop.xlane.xlu1 %1980  ;;  %2319 = vadd.xlane.f32.xlu0 %v2318_v3  ;;  %v2315_v23 = vsel %vm229_vm1, %v5370_v53, 0.0  ;;  %4476 = vpow2.f32 %v2211_v43 }
 0x3e9   : > { %2316 = vadd.xlane.f32.xlu1 %v2315_v23 }
 0x3ea   : > { %v5380_v41 = vpop.eup %4464 }
 0x3eb   : > { %5960 = vst [vmem:[#allocation32_spill] sm:$0xff] %v5380_v41  ;;  %v5384_v61 = vpop.eup %4466  ;;  %v5386_v8 = vpop.xlane.xlu0 %1989  ;;  %v2324_v17 = vsel %vm229_vm1, %v5380_v41, 0.0 }
 0x3ec   : > { %5962 = vst [vmem:[#allocation15_spill] sm:$0xff] %v5384_v61  ;;  %v5390_v49 = vpop.eup %4468  ;;  %v5392_v3 = vpop.xlane.xlu1 %1986  ;;  %2325 = vadd.xlane.f32.xlu0 %v2324_v17  ;;  %v2321_v23 = vsel %vm229_vm1, %v5384_v61, 0.0  ;;  %v5966_v17 = vld [vmem:[#allocation18_spill] sm:$0xff] }
 0x3ed   : > { %5963 = vst [vmem:[#allocation33_spill] sm:$0xff] %v5390_v49  ;;  %2322 = vadd.xlane.f32.xlu1 %v2321_v23  ;;  %v2351_v53 = vsel %vm229_vm1, %v5390_v49, 0.0  ;;  %v5402_v41 = vpop.eup %4470  ;;  %v2098_v61 = vsub.f32 %v5966_v17, %v5296_v5  ;;  %v2213_v23 = vmul.f32 1.442695, %v2097_v28 }
 0x3ee   : > { %5965 = vst [vmem:[#allocation19_spill] sm:$0xff] %v5402_v41  ;;  %v2354_v9 = vsel %vm229_vm1, %v5402_v41, 0.0  ;;  %v5412_v58 = vpop.eup %4472 }
 0x3ef   : > { %v5398_v19 = vpop.xlane.xlu0 %1995  ;;  %5967 = vst [vmem:[#allocation18_spill] sm:$0xff] %v5412_v58  ;;  %v2215_v49 = vmul.f32 1.442695, %v2098_v61  ;;  %4478 = vpow2.f32 %v2213_v23  ;;  %v2384_v5 = vsel %vm229_vm1, %v5412_v58, 0.0  ;;  %v5422_v28 = vpop.eup %4474 }
 0x3f0   : > { %v5404_v18 = vpop.xlane.xlu1 %1992  ;;  %2352 = vadd.xlane.f32.xlu0 %v2351_v53  ;;  %v2076_v53 = vsub.f32 %v5968_v20, %v5346_v62  ;;  %5969 = vst [vmem:[#allocation7_spill] sm:$0xff] %v5422_v28  ;;  %v2387_v62 = vsel %vm229_vm1, %v5422_v28, 0.0  ;;  %v294_v20 = vld [vmem:[%s5878_s2 + $0x48] sm:$0xff] }
 0x3f1   : > { %4480 = vpow2.f32 %v2215_v49  ;;  %v5971_v49 = vld [vmem:[#allocation8_spill] sm:$0xff] }
 0x3f2   : > { %v2171_v41 = vmul.f32 1.442695, %v2076_v53  ;;  %v5435_v23 = vpop.eup %4476  ;;  %v2086_v53 = vsub.f32 %v5971_v49, %v5358_v45  ;;  %v5973_v49 = vld [vmem:[#allocation10_spill] sm:$0xff] }
 0x3f3   : > { %v5408_v27 = vpop.xlane.xlu0 %2025  ;;  %5970 = vst [vmem:[#allocation34_spill] sm:$0xff] %v5435_v23 }
 0x3f4   : > { %v5414_v4 = vpop.xlane.xlu1 %2022  ;;  %2355 = vadd.xlane.f32.xlu0 %v2354_v9  ;;  %v2075_v9 = vsub.f32 %v4986_v25, %v5350_v13  ;;  %4482 = vpow2.f32 %v2171_v41  ;;  %v2390_v13 = vsel %vm229_vm1, %v5435_v23, 0.0  ;;  %v2191_v47 = vmul.f32 1.442695, %v2086_v53 }
 0x3f5   : > { %v2088_v23 = vsub.f32 %v5973_v49, %v5372_v38  ;;  %v5974_v49 = vld [vmem:[#allocation11_spill] sm:$0xff] }
 0x3f7   : > { %v5418_v43 = vpop.xlane.xlu0 %2031 }
 0x3f8   : > { %v5424_v17 = vpop.xlane.xlu1 %2028  ;;  %2385 = vadd.xlane.f32.xlu0 %v2384_v5  ;;  %v2169_v5 = vmul.f32 1.442695, %v2075_v9 }
 0x3f9   : > { %v5445_v28 = vpop.eup %4478 }
 0x3fa   : > { %4484 = vpow2.f32 %v2169_v5  ;;  %v2393_v45 = vsel %vm229_vm1, %v5445_v28, 0.0 }
 0x3fb   : > { %v5428_v61 = vpop.xlane.xlu0 %2037  ;;  %v5453_v41 = vpop.eup %4480  ;;  %4486 = vpow2.f32 %v2191_v47  ;;  %v2087_v47 = vsub.f32 %v4994_v29, %v5376_v39  ;;  %v5975_v29 = vsub.f32 %v5048_v40, %v5264_v52  ;;  %v2092_v52 = vsub.f32 %v5000_v32, %v5398_v19 }
 0x3fc   : > { %v5437_v58 = vpop.xlane.xlu1 %2034  ;;  %2388 = vadd.xlane.f32.xlu0 %v2387_v62  ;;  %v5972_v62 = vld [vmem:[#allocation9_spill] sm:$0xff]  ;;  %v2396_v5 = vsel %vm229_vm1, %v5453_v41, 0.0 }
 0x3fd   : > { %v2085_v16 = vsub.f32 %v5972_v62, %v5362_v15  ;;  %v2195_v62 = vmul.f32 1.442695, %v2088_v23  ;;  %v2205_v39 = vmul.f32 1.442695, %v5975_v29  ;;  %v5976_v23 = vld [vmem:[#allocation12_spill] sm:$0xff] }
 0x3fe   : > { %344 = vperm.xlu1 %4393, %v294_v20   ;;  %v5459_v15 = vpop.eup %4482 }
 0x3ff   : > { %v5441_v25 = vpop.xlane.xlu0 %2043  ;;  %v2189_v20 = vmul.f32 1.442695, %v2085_v16 }
 0x400   : > { %v5447_v21 = vpop.xlane.xlu1 %2040  ;;  %2391 = vadd.xlane.f32.xlu0 %v2390_v13 }
 0x403   : > { %v2290_v12 = vpop.xlane.xlu0 %2289 }
 0x404   : > { %v2287_v9 = vpop.xlane.xlu1 %2286  ;;  %2394 = vadd.xlane.f32.xlu0 %v2393_v45  ;;  %4488 = vrcp.f32 %v2290_v12  ;;  %v2330_v12 = vsel %vm229_vm1, %v5459_v15, 0.0  ;;  %v5465_v38 = vpop.eup %4484 }
 0x405   : > { %4490 = vrcp.f32 %v2287_v9  ;;  %v2193_v9 = vmul.f32 1.442695, %v2087_v47 }
 0x407   : > { %v2242_v53 = vpop.xlane.xlu0 %2241 }
 0x408   : > { %4492 = vrcp.f32 %v2242_v53  ;;  %v2239_v13 = vpop.xlane.xlu1 %2238  ;;  %2397 = vadd.xlane.f32.xlu0 %v2396_v5  ;;  %v2090_v53 = vsub.f32 %v5974_v49, %v5386_v8  ;;  %v2089_v5 = vsub.f32 %v5976_v23, %v5392_v3 }
 0x409   : > { %4494 = vrcp.f32 %v2239_v13 }
 0x40a   : > { %4496 = vpow2.f32 %v2189_v20  ;;  %v5469_v20 = vpop.eup %4486  ;;  %v2199_v40 = vmul.f32 1.442695, %v2090_v53  ;;  %v2197_v29 = vmul.f32 1.442695, %v2089_v5 }
 0x40b   : > { %v2296_v16 = vpop.xlane.xlu0 %2295 }
 0x40c   : > { %4498 = vrcp.f32 %v2296_v16  ;;  %v2293_v45 = vpop.xlane.xlu1 %2292  ;;  %2331 = vadd.xlane.f32.xlu0 %v2330_v12  ;;  %v2327_v16 = vsel %vm229_vm1, %v5465_v38, 0.0 }
 0x40d   : > { %4500 = vrcp.f32 %v2293_v45 }
 0x40e   : > { %4502 = vpow2.f32 %v2195_v62  ;;  %v4489_v12 = vpop.eup %4488 }
 0x40f   : > { %v2248_v13 = vpop.xlane.xlu0 %2247  ;;  %v4491_v47 = vpop.eup %4490  ;;  %v5479_v8 = vmul.f32 %v4489_v12, %v5168_v24  ;;  %v2360_v24 = vsel %vm229_vm1, %v5469_v20, 0.0 }
 0x410   : > { %4504 = vrcp.f32 %v2248_v13  ;;  %v2245_v62 = vpop.xlane.xlu1 %2244  ;;  %2328 = vadd.xlane.f32.xlu0 %v2327_v16  ;;  %v5484_v3 = vmul.f32 %v4491_v47, %v5170_v22 }
 0x411   : > { %4506 = vrcp.f32 %v2245_v62 }
 0x412   : > { %v4493_v45 = vpop.eup %4492  ;;  %4508 = vpow2.f32 %v2193_v9  ;;  %v2105_v9 = vsub.f32 %v5094_v60, %v5437_v58  ;;  %v4275_v22 = vpack.c.bf16 %v5479_v8, %v5484_v3  ;;  %v2091_v60 = vsub.f32 %v5002_v33, %v5404_v18 }
 0x413   : > { %v4495_v49 = vpop.eup %4494  ;;  %4510 = vpow2.f32 %v2205_v39  ;;  %v2558_v23 = vmul.f32 %v4493_v45, %v5176_v48  ;;  %v2302_v13 = vpop.xlane.xlu0 %2301  ;;  %v2203_v39 = vmul.f32 1.442695, %v2092_v52  ;;  %v5979_v33 = vmov 0.0|0.0   ;;  %v5980_v52 = vld [vmem:[#allocation16_spill] sm:$0xff] }
 0x414   : > { %v5489_v16 = vpop.eup %4496  ;;  %v2557_v53 = vmul.f32 %v4495_v49, %v5180_v50  ;;  %4512 = vrcp.f32 %v2302_v13  ;;  %v2299_v32 = vpop.xlane.xlu1 %2298  ;;  %2361 = vadd.xlane.f32.xlu0 %v2360_v24  ;;  %v2229_v45 = vmul.f32 1.442695, %v2105_v9  ;;  %v2201_v18 = vmul.f32 1.442695, %v2091_v60 }
 0x415   : > { %4514 = vrcp.f32 %v2299_v32  ;;  %v2357_v62 = vsel %vm229_vm1, %v5489_v16, 0.0 }
 0x416   : > { %v4499_v19 = vpop.eup %4498  ;;  %4516 = vpow2.f32 %v2199_v40  ;;  %v4243_v50 = vpack.c.bf16 %v2558_v23, %v2557_v53 }
 0x417   : > { %v4501_v58 = vpop.eup %4500  ;;  %4518 = vpow2.f32 %v2197_v29  ;;  %v5505_v5 = vmul.f32 %v4499_v19, %v5184_v2  ;;  %v2254_v12 = vpop.xlane.xlu0 %2253  ;;  %v2102_v29 = vsub.f32 %v5980_v52, %v5408_v27 }
 0x418   : > { %v5509_v47 = vpop.eup %4502  ;;  %v5512_v49 = vmul.f32 %v4501_v58, %v5188_v31  ;;  %4520 = vrcp.f32 %v2254_v12  ;;  %v2251_v40 = vpop.xlane.xlu1 %2250  ;;  %2358 = vadd.xlane.f32.xlu0 %v2357_v62  ;;  %4245 = vmatpush3.bf16.xpose.msk.msra.mxu0 %vm5498_vm5, %v4243_v50 }
 0x419   : > { %4522 = vrcp.f32 %v2251_v40  ;;  %4246 = vmatprep.subr.bf16.mxu0 %v5979_v33  ;;  %v2366_v24 = vsel %vm229_vm1, %v5509_v47, 0.0  ;;  %v2223_v27 = vmul.f32 1.442695, %v2102_v29 }
 0x41a   : > { %v4505_v2 = vpop.eup %4504  ;;  %4524 = vpow2.f32 %v2203_v39  ;;  %v4279_v23 = vpack.c.bf16 %v5505_v5, %v5512_v49  ;;  %v2101_v39 = vsub.f32 %v5062_v59, %v5414_v4 }
 0x41b   : > { %v4507_v31 = vpop.eup %4506  ;;  %v2560_v13 = vmul.f32 %v4505_v2, %v5192_v26  ;;  %4526 = vpow2.f32 %v2229_v45  ;;  %v2104_v45 = vsub.f32 %v5078_v51, %v5418_v43  ;;  %v2103_v43 = vsub.f32 %v5082_v0, %v5424_v17 }
 0x41c   : > { %v5524_v9 = vpop.eup %4508  ;;  %v2559_v53 = vmul.f32 %v4507_v31, %v5196_v46  ;;  %2367 = vadd.xlane.f32.xlu0 %v2366_v24  ;;  %4528 = vpow2.f32 %v2201_v18  ;;  %v2221_v4 = vmul.f32 1.442695, %v2101_v39  ;;  %v2106_v0 = vsub.f32 %v5092_v36, %v5428_v61 }
 0x41d   : > { %v5527_v32 = vpop.eup %4510  ;;  %v2363_v58 = vsel %vm229_vm1, %v5524_v9, 0.0  ;;  %4530 = vpow2.f32 %v2223_v27  ;;  %v2227_v51 = vmul.f32 1.442695, %v2104_v45  ;;  %v5982_v36 = vsub.f32 %v5080_v63, %v5314_v56  ;;  %v295_v63 = vld [vmem:[%s5878_s2 + $0x50] sm:$0xff] }
 0x41e   : > { %v4513_v19 = vpop.eup %4512  ;;  %v4247_v60 = vpack.c.bf16 %v2560_v13, %v2559_v53  ;;  %v2381_v59 = vsel %vm229_vm1, %v5527_v32, 0.0  ;;  %4532 = vpow2.f32 %v2221_v4  ;;  %v2231_v39 = vmul.f32 1.442695, %v2106_v0 }
 0x41f   : > { %v4515_v50 = vpop.eup %4514  ;;  %v5532_v26 = vmul.f32 %v4513_v19, %v5200_v42  ;;  %4534 = vpow2.f32 %v2227_v51  ;;  %v2225_v19 = vmul.f32 1.442695, %v2103_v43  ;;  %v2217_v61 = vmul.f32 1.442695, %v5982_v36  ;;  %v3396_v36 = vld [vmem:[%s5880_s4 + $0x18] sm:$0xff] }
 0x420   : > { %v5536_v12 = vpop.eup %4516  ;;  %v5539_v46 = vmul.f32 %v4515_v50, %v5204_v55  ;;  %2364 = vadd.xlane.f32.xlu0 %v2363_v58  ;;  %4249 = vmatpush3.bf16.xpose.msk.msra.mxu0 %vm5498_vm5, %v4247_v60  ;;  %v5981_v58 = vld [vmem:[#allocation20_spill] sm:$0xff]  ;;  %v2107_v56 = vsub.f32 %v5106_v37, %v5447_v21 }
 0x421   : > { %v5543_v62 = vpop.eup %4518  ;;  %4250 = vmatprep.subr.bf16.mxu0 %v5979_v33  ;;  %v2372_v18 = vsel %vm229_vm1, %v5536_v12, 0.0  ;;  %4536 = vpow2.f32 %v2225_v19 }
 0x422   : > { %v4521_v42 = vpop.eup %4520  ;;  %2382 = vadd.xlane.f32.xlu1 %v2381_v59  ;;  %v4283_v55 = vpack.c.bf16 %v5532_v26, %v5539_v46  ;;  %v2369_v31 = vsel %vm229_vm1, %v5543_v62, 0.0  ;;  %v2100_v59 = vsub.f32 %v5981_v58, %v5312_v30  ;;  %4538 = vpow2.f32 %v2231_v39  ;;  %v3395_v39 = vld [vmem:[%s5880_s4 + $0x10] sm:$0xff] }
 0x423   : > { %v4523_v40 = vpop.eup %4522  ;;  %v2562_v2 = vmul.f32 %v4521_v42, %v5208_v44  ;;  %4540 = vpow2.f32 %v2217_v61  ;;  %v2233_v51 = vmul.f32 1.442695, %v2107_v56 }
 0x424   : > { %v5555_v52 = vpop.eup %4524  ;;  %v2561_v29 = vmul.f32 %v4523_v40, %v5212_v54  ;;  %2373 = vadd.xlane.f32.xlu0 %v2372_v18  ;;  %v2219_v45 = vmul.f32 1.442695, %v2100_v59  ;;  %v2108_v40 = vsub.f32 %v5104_v1, %v5441_v25 }
 0x425   : > { %v5560_v13 = vpop.eup %4526  ;;  %v2378_v24 = vsel %vm229_vm1, %v5555_v52, 0.0 }
 0x426   : > { %2370 = vadd.xlane.f32.xlu1 %v2369_v31  ;;  %v4251_v44 = vpack.c.bf16 %v2562_v2, %v2561_v29  ;;  %v5566_v53 = vpop.eup %4528  ;;  %v2417_v54 = vsel %vm229_vm1, %v5560_v13, 0.0  ;;  %4542 = vpow2.f32 %v2219_v45  ;;  %v2235_v29 = vmul.f32 1.442695, %v2108_v40  ;;  %v3393_v31 = vld [vmem:[%s5880_s4] sm:$0xff] }
 0x427   : > { %v2375_v17 = vsel %vm229_vm1, %v5566_v53, 0.0  ;;  %v5577_v27 = vpop.eup %4530 }
 0x428   : > { %2379 = vadd.xlane.f32.xlu0 %v2378_v24  ;;  %4253 = vmatpush3.bf16.xpose.msk.msra.mxu0 %vm5498_vm5, %v4251_v44  ;;  %v2408_v60 = vsel %vm229_vm1, %v5577_v27, 0.0  ;;  %v5581_v50 = vpop.eup %4532  ;;  %4544 = vpow2.f32 %v2235_v29  ;;  %v3394_v24 = vld [vmem:[%s5880_s4 + $0x8] sm:$0xff] }
 0x429   : > { %4254 = vmatprep.subr.bf16.mxu0 %v5979_v33  ;;  %v2405_v42 = vsel %vm229_vm1, %v5581_v50, 0.0  ;;  %v5590_v4 = vpop.eup %4534  ;;  %4546 = vpow2.f32 %v2233_v51 }
 0x42a   : > { %2418 = vadd.xlane.f32.xlu1 %v2417_v54  ;;  %v2414_v2 = vsel %vm229_vm1, %v5590_v4, 0.0 }
 0x42b   : > { %v5596_v30 = vpop.eup %4536 }
 0x42c   : > { %2376 = vadd.xlane.f32.xlu0 %v2375_v17  ;;  %v2411_v1 = vsel %vm229_vm1, %v5596_v30, 0.0  ;;  %v5607_v25 = vpop.eup %4538 }
 0x42d   : > { %v2420_v21 = vsel %vm229_vm1, %v5607_v25, 0.0  ;;  %v5618_v44 = vpop.eup %4540 }
 0x42e   : > { %v2399_v0 = vsel %vm229_vm1, %v5618_v44, 0.0 }
 0x430   : > { %2409 = vadd.xlane.f32.xlu0 %v2408_v60  ;;  %v5625_v17 = vpop.eup %4542 }
 0x431   : > { %v2402_v58 = vsel %vm229_vm1, %v5625_v17, 0.0 }
 0x432   : > { %v5634_v59 = vpop.eup %4544 }
 0x433   : > { %v5641_v45 = vpop.eup %4546  ;;  %v2426_v40 = vsel %vm229_vm1, %v5634_v59, 0.0 }
 0x434   : > { %2406 = vadd.xlane.f32.xlu0 %v2405_v42 }
 0x435   : > { %v5603_v18 = vpop.xlane.xlu0 %2337 }
 0x436   : > { %v5614_v37 = vpop.xlane.xlu1 %2334 }
 0x438   : > { %2415 = vadd.xlane.f32.xlu0 %v2414_v2 }
 0x43b   : > { %349 = vperm.xlu1 %4393, %v295_v63  }
 0x43c   : > { %2412 = vadd.xlane.f32.xlu0 %v2411_v1 }
 0x43d   : > { %v5612_v43 = vpop.xlane.xlu0 %2343 }
 0x43f   : > { %3399 = vperm.xlu1 %4393, %v3393_v31   ;;  %v2423_v31 = vsel %vm229_vm1, %v5641_v45, 0.0 }
 0x440   : > { %2421 = vadd.xlane.f32.xlu0 %v2420_v21 }
 0x441   : > { %v2260_v54 = vpop.xlane.xlu0 %2259 }
 0x442   : > { %4548 = vrcp.f32 %v2260_v54  ;;  %v2257_v19 = vpop.xlane.xlu1 %2256 }
 0x443   : > { %4550 = vrcp.f32 %v2257_v19  ;;  %3404 = vperm.xlu1 %4393, %v3394_v24   ;;  %v5983_v19 = vld [vmem:[#allocation21_spill] sm:$0xff] }
 0x444   : > { %2400 = vadd.xlane.f32.xlu0 %v2399_v0 }
 0x445   : > { %v5630_v60 = vpop.xlane.xlu0 %2340 }
 0x447   : > { %3409 = vperm.xlu1 %4393, %v3395_v39  }
 0x448   : > { %2403 = vadd.xlane.f32.xlu0 %v2402_v58 }
 0x449   : > { %v5639_v61 = vpop.xlane.xlu0 %2349 }
 0x44a   : > { %v2263_v42 = vpop.xlane.xlu1 %2262 }
 0x44b   : > { %3414 = vperm.xlu1 %4393, %v3396_v36   ;;  %4552 = vrcp.f32 %v2263_v42 }
 0x44c   : > { %v4549_v2 = vpop.eup %4548  ;;  %2427 = vadd.xlane.f32.xlu0 %v2426_v40 }
 0x44d   : > { %v4551_v63 = vpop.eup %4550  ;;  %v2564_v56 = vmul.f32 %v4549_v2, %v5246_v6  ;;  %v2266_v29 = vpop.xlane.xlu0 %2265  ;;  %v5985_v2 = vmov 0.0  }
 0x44e   : > { %v2563_v1 = vmul.f32 %v4551_v63, %v5248_v7  ;;  %4554 = vrcp.f32 %v2266_v29  ;;  %v5984_v7 = vld [vmem:[#allocation3_spill] sm:$0xff] }
 0x44f   : > { %v5656_v0 = vadd.f32 %v5984_v7, %v5983_v19 }
 0x450   : > { %2424 = vadd.xlane.f32.xlu0 %v2423_v31  ;;  %v4255_v51 = vpack.c.bf16 %v2564_v56, %v2563_v1  ;;  %v296_v1 = vld [vmem:[%s5878_s2 + $0x58] sm:$0xff] }
 0x451   : > { %v5649_v21 = vpop.xlane.xlu0 %2346 }
 0x452   : > { %v2269_v24 = vpop.xlane.xlu1 %2268  ;;  %4257 = vmatpush3.bf16.xpose.msk.msra.mxu0 %vm5498_vm5, %v4255_v51 }
 0x453   : > { %4274 = vmatprep.subr.bf16.mxu0 %v5979_v33  ;;  %4556 = vrcp.f32 %v2269_v24 }
 0x455   : > { %v2272_v54 = vpop.xlane.xlu0 %2271  ;;  %v4553_v6 = vpop.eup %4552 }
 0x456   : > { %4558 = vrcp.f32 %v2272_v54  ;;  %v2565_v58 = vmul.f32 %v4553_v6, %v5268_v10  ;;  %v5987_v6 = vld [vmem:[#allocation29_spill] sm:$0xff] }
 0x458   : > { %v4555_v39 = vpop.eup %4554 }
 0x459   : > { %v2566_v36 = vmul.f32 %v4555_v39, %v5272_v57  ;;  %4085 = vmatmul.mubr.msk.f32.vlgmr.msra.gmra.mrb[34].mxu0 %vm229_vm1, %v5656_v0  ;;  %v2278_v42 = vpop.xlane.xlu0 %2277 }
 0x45a   : > { %4560 = vrcp.f32 %v2278_v42  ;;  %v2275_v40 = vpop.xlane.xlu1 %2274  ;;  %4277 = vmatpush3.bf16.xpose.msk.msra.mxu0 %vm5498_vm5, %v4275_v22  ;;  %4122 = vmatprep.mubr.msk.f32.mxu0 %vm4662_vm4, %v5985_v2  ;;  %v5988_v42 = vld [vmem:[#allocation30_spill] sm:$0xff] }
 0x45b   : > { %4562 = vrcp.f32 %v2275_v40  ;;  %v4259_v63 = vpack.c.bf16 %v2566_v36, %v2565_v58  ;;  %4278 = vmatprep.subr.bf16.mxu0 %v5979_v33  ;;  %v5989_v40 = vld [vmem:[#allocation31_spill] sm:$0xff] }
 0x45d   : > { %4261 = vmatpush3.bf16.xpose.msk.msra.mxu1 %vm5498_vm5, %v4259_v63  ;;  %v4557_v10 = vpop.eup %4556 }
 0x45e   : > { %4262 = vmatprep.subr.bf16.mxu1 %v5979_v33  ;;  %v2567_v56 = vmul.f32 %v4557_v10, %v5286_v11 }
 0x460   : > { %v4559_v57 = vpop.eup %4558 }
 0x461   : > { %v2568_v8 = vmul.f32 %v4559_v57, %v5290_v35  ;;  %v2284_v3 = vpop.xlane.xlu0 %2283  ;;  %v543_v57 = vcombine.high %v5656_v0, %v5656_v0  ;;  %v5991_v0 = vld [vmem:[#allocation13_spill] sm:$0xff] }
 0x462   : > { %4564 = vrcp.f32 %v2284_v3  ;;  %v2281_v22 = vpop.xlane.xlu1 %2280  ;;  %4281 = vmatpush3.bf16.xpose.msk.msra.mxu0 %vm5498_vm5, %v4279_v23 }
 0x463   : > { %4566 = vrcp.f32 %v2281_v22  ;;  %v4263_v29 = vpack.c.bf16 %v2568_v8, %v2567_v56  ;;  %4282 = vmatprep.subr.bf16.mxu0 %v5979_v33 }
 0x464   : > { %v4561_v11 = vpop.eup %4560 }
 0x465   : > { %v4563_v31 = vpop.eup %4562  ;;  %4265 = vmatpush3.bf16.xpose.msk.msra.mxu1 %vm5498_vm5, %v4263_v29  ;;  %v2570_v35 = vmul.f32 %v4561_v11, %v5302_v14  ;;  %v5986_v14 = vld [vmem:[#allocation28_spill] sm:$0xff] }
 0x466   : > { %354 = vperm.xlu0 %4392, %v296_v1   ;;  %4266 = vmatprep.subr.bf16.mxu1 %v5979_v33  ;;  %v2569_v5 = vmul.f32 %v4563_v31, %v5304_v34  ;;  %v5990_v1 = vld [vmem:[#allocation6_spill] sm:$0xff] }
 0x468   : > { %v4267_v23 = vpack.c.bf16 %v2570_v35, %v2569_v5  ;;  %v5992_v35 = vld [vmem:[#allocation22_spill] sm:$0xff] }
 0x469   : > { %v2308_v49 = vpop.xlane.xlu0 %2307 }
 0x46a   : > { %4285 = vmatpush3.bf16.xpose.msk.msra.mxu0 %vm5498_vm5, %v4283_v55  ;;  %4568 = vrcp.f32 %v2308_v49 }
 0x46b   : > { %4286 = vmatprep.subr.bf16.mxu0 %v5979_v33 }
 0x46c   : > { %v4565_v51 = vpop.eup %4564 }
 0x46d   : > { %v4567_v24 = vpop.eup %4566  ;;  %4269 = vmatpush3.bf16.xpose.msk.msra.mxu1 %vm5498_vm5, %v4267_v23  ;;  %v2305_v54 = vpop.xlane.xlu0 %2304  ;;  %v2572_v34 = vmul.f32 %v4565_v51, %v5986_v14 }
 0x46e   : > { %4570 = vrcp.f32 %v2305_v54  ;;  %4270 = vmatprep.subr.bf16.mxu1 %v5979_v33  ;;  %v2571_v26 = vmul.f32 %v4567_v24, %v5987_v6 }
 0x46f   : > { %4572 = vrcp.f32 %v5603_v18 }
 0x470   : > { %4574 = vrcp.f32 %v5614_v37  ;;  %v4271_v19 = vpack.c.bf16 %v2572_v34, %v2571_v26  ;;  %v5994_v34 = vld [vmem:[#allocation2_spill] sm:$0xff] }
 0x471   : > { %v2314_v46 = vpop.xlane.xlu0 %2313 }
 0x472   : > { %4576 = vrcp.f32 %v2314_v46  ;;  %v2311_v55 = vpop.xlane.xlu1 %2310 }
 0x473   : > { %4578 = vrcp.f32 %v2311_v55  ;;  %v5995_v55 = vld [vmem:[#allocation14_spill] sm:$0xff] }
 0x474   : > { %v4569_v39 = vpop.eup %4568 }
 0x475   : > { %4273 = vmatpush3.bf16.xpose.msk.msra.mxu1 %vm5498_vm5, %v4271_v19  ;;  %v2320_v7 = vpop.xlane.xlu0 %2319  ;;  %v2580_v18 = vmul.f32 %v4569_v39, %v5988_v42 }
 0x476   : > { %4580 = vrcp.f32 %v2320_v7  ;;  %v2317_v58 = vpop.xlane.xlu1 %2316  ;;  %4290 = vmatprep.subr.bf16.mxu1 %v5979_v33  ;;  %v5996_v7 = vld [vmem:[#allocation17_spill] sm:$0xff] }
 0x477   : > { %4582 = vrcp.f32 %v2317_v58 }
 0x478   : > { %v4571_v36 = vpop.eup %4570  ;;  %4584 = vrcp.f32 %v5630_v60 }
 0x479   : > { %v2579_v37 = vmul.f32 %v4571_v36, %v5989_v40  ;;  %v2326_v63 = vpop.xlane.xlu0 %2325  ;;  %v4573_v10 = vpop.eup %4572  ;;  %4586 = vrcp.f32 %v5612_v43  ;;  %v5993_v43 = vld [vmem:[#allocation23_spill] sm:$0xff]  ;;  %v5997_v36 = vld [vmem:[#allocation25_spill] sm:$0xff] }
 0x47a   : > { %v2323_v56 = vpop.xlane.xlu1 %2322  ;;  %v4575_v8 = vpop.eup %4574  ;;  %4588 = vrcp.f32 %v2326_v63  ;;  %v2590_v5 = vmul.f32 %v4573_v10, %v5992_v35 }
 0x47b   : > { %v4287_v3 = vpack.c.bf16 %v2580_v18, %v2579_v37  ;;  %v2589_v49 = vmul.f32 %v4575_v8, %v5993_v43  ;;  %4590 = vrcp.f32 %v2323_v56  ;;  %v5998_v37 = vld [vmem:[#allocation24_spill] sm:$0xff] }
 0x47c   : > { %v4577_v22 = vpop.eup %4576  ;;  %4104 = vmatmul.mubr.msk.f32.vlgmr.msra.gmra.mrb[42].mxu1 %vm229_vm1, %v543_v57  ;;  %4592 = vrcp.f32 %v5649_v21  ;;  %v5999_v8 = vld [vmem:[#allocation32_spill] sm:$0xff] }
 0x47d   : > { %v4579_v29 = vpop.eup %4578  ;;  %v2582_v11 = vmul.f32 %v4577_v22, %v5990_v1  ;;  %4289 = vmatpush3.bf16.xpose.msk.msra.mxu0 %vm5498_vm5, %v4287_v3  ;;  %v2353_v31 = vpop.xlane.xlu0 %2352  ;;  %4141 = vmatprep.mubr.msk.f32.mxu1 %vm4662_vm4, %v5985_v2  ;;  %v4307_v26 = vpack.c.bf16 %v2590_v5, %v2589_v49  ;;  %4594 = vrcp.f32 %v5639_v61  ;;  %v6000_v22 = vld [vmem:[#allocation15_spill] sm:$0xff]  ;;  %v6002_v5 = vld [vmem:[#allocation26_spill] sm:$0xff] }
 0x47e   : > { %v2581_v60 = vmul.f32 %v4579_v29, %v5991_v0  ;;  %4306 = vmatprep.subr.bf16.mxu0 %v5979_v33  ;;  %v345_v23 = vpop.permute.xlu1 %344  ;;  %v6001_v0 = vld [vmem:[#allocation27_spill] sm:$0xff] }
 0x47f   : > { %v5723_v6 = vadd.f32 %v5994_v34, %v345_v23  ;;  %v6004_v34 = vld [vmem:[#allocation33_spill] sm:$0xff] }
 0x480   : > { %v4581_v51 = vpop.eup %4580  ;;  %v4291_v24 = vpack.c.bf16 %v2582_v11, %v2581_v60 }
 0x481   : > { %v4583_v54 = vpop.eup %4582  ;;  %v2356_v14 = vpop.xlane.xlu0 %2355  ;;  %v2584_v19 = vmul.f32 %v4581_v51, %v5995_v55 }
 0x482   : > { %4293 = vmatpush3.bf16.xpose.msk.msra.mxu1 %vm5498_vm5, %v4291_v24  ;;  %v4585_v46 = vpop.eup %4584  ;;  %v2583_v39 = vmul.f32 %v4583_v54, %v5996_v7  ;;  %4596 = vrcp.f32 %v2356_v14  ;;  %v6003_v54 = vld [vmem:[#allocation19_spill] sm:$0xff] }
 0x483   : > { %4294 = vmatprep.subr.bf16.mxu1 %v5979_v33  ;;  %v4587_v58 = vpop.eup %4586  ;;  %v2591_v42 = vmul.f32 %v4585_v46, %v5997_v36  ;;  %4598 = vrcp.f32 %v2353_v31 }
 0x484   : > { %4123 = vmatmul.mubr.msk.f32.vlgmr.msra.gmra.mrb[36].mxu0 %vm229_vm1, %v5723_v6  ;;  %v4589_v61 = vpop.eup %4588  ;;  %v4295_v18 = vpack.c.bf16 %v2584_v19, %v2583_v39  ;;  %v2592_v63 = vmul.f32 %v4587_v58, %v5998_v37 }
 0x485   : > { %4309 = vmatpush3.bf16.xpose.msk.msra.mxu0 %vm5498_vm5, %v4307_v26  ;;  %v2386_v21 = vpop.xlane.xlu0 %2385  ;;  %4160 = vmatprep.mubr.msk.f32.mxu0 %vm4662_vm4, %v5985_v2  ;;  %v4591_v40 = vpop.eup %4590  ;;  %v2586_v3 = vmul.f32 %v4589_v61, %v5999_v8 }
 0x486   : > { %4310 = vmatprep.subr.bf16.mxu0 %v5979_v33  ;;  %v4311_v57 = vpack.c.bf16 %v2592_v63, %v2591_v42  ;;  %v4593_v56 = vpop.eup %4592  ;;  %v2585_v29 = vmul.f32 %v4591_v40, %v6000_v22 }
 0x487   : > { %v4595_v11 = vpop.eup %4594  ;;  %v2593_v60 = vmul.f32 %v4593_v56, %v6001_v0 }
 0x488   : > { %v4299_v35 = vpack.c.bf16 %v2586_v3, %v2585_v29  ;;  %v2594_v43 = vmul.f32 %v4595_v11, %v6002_v5  ;;  %v544_v3 = vcombine.high %v5723_v6, %v5723_v6  ;;  %v6005_v5 = vld [vmem:[#allocation18_spill] sm:$0xff] }
 0x489   : > { %v5740_v10 = vpop.xlane.xlu0 %2388 }
 0x48a   : > { %4297 = vmatpush3.bf16.xpose.msk.msra.mxu1 %vm5498_vm5, %v4295_v18  ;;  %v4315_v23 = vpack.c.bf16 %v2594_v43, %v2593_v60 }
 0x48b   : > { %4298 = vmatprep.subr.bf16.mxu1 %v5979_v33 }
 0x48c   : > { %v4597_v31 = vpop.eup %4596 }
 0x48d   : > { %4313 = vmatpush3.bf16.xpose.msk.msra.mxu0 %vm5498_vm5, %v4311_v57  ;;  %v2392_v1 = vpop.xlane.xlu0 %2391  ;;  %v4599_v24 = vpop.eup %4598  ;;  %v2596_v14 = vmul.f32 %v4597_v31, %v6003_v54  ;;  %v6006_v54 = vld [vmem:[#allocation5_spill] sm:$0xff] }
 0x48e   : > { %4314 = vmatprep.subr.bf16.mxu0 %v5979_v33  ;;  %v2595_v26 = vmul.f32 %v4599_v24, %v6004_v34 }
 0x490   : > { %v4319_v55 = vpack.c.bf16 %v2596_v14, %v2595_v26 }
 0x491   : > { %v5752_v49 = vpop.xlane.xlu0 %2394 }
 0x492   : > { %4301 = vmatpush3.bf16.xpose.msk.msra.mxu1 %vm5498_vm5, %v4299_v35 }
 0x493   : > { %4302 = vmatprep.subr.bf16.mxu1 %v5979_v33 }
 0x495   : > { %4317 = vmatpush3.bf16.xpose.msk.msra.mxu0 %vm5498_vm5, %v4315_v23  ;;  %v2398_v51 = vpop.xlane.xlu0 %2397 }
 0x496   : > { %4318 = vmatprep.subr.bf16.mxu0 %v5979_v33 }
 0x499   : > { %v2332_v46 = vpop.xlane.xlu0 %2331 }
 0x49a   : > { %4600 = vrcp.f32 %v2332_v46  ;;  %v6007_v46 = vld [vmem:[#allocation34_spill] sm:$0xff] }
 0x49d   : > { %4321 = vmatpush3.bf16.xpose.msk.msra.mxu0 %vm5498_vm5, %v4319_v55  ;;  %v2329_v19 = vpop.xlane.xlu0 %2328 }
 0x49e   : > { %4602 = vrcp.f32 %v2329_v19  ;;  %4338 = vmatprep.subr.bf16.mxu0 %v5979_v33 }
 0x4a1   : > { %v2362_v7 = vpop.xlane.xlu0 %2361 }
 0x4a2   : > { %4604 = vrcp.f32 %v2362_v7  ;;  %v6008_v7 = vld [vmem:[#allocation7_spill] sm:$0xff] }
 0x4a4   : > { %v4601_v58 = vpop.eup %4600 }
 0x4a5   : > { %v2359_v39 = vpop.xlane.xlu0 %2358  ;;  %v2588_v42 = vmul.f32 %v4601_v58, %v5459_v15 }
 0x4a6   : > { %4606 = vrcp.f32 %v2359_v39 }
 0x4a8   : > { %v4603_v36 = vpop.eup %4602 }
 0x4a9   : > { %v2587_v61 = vmul.f32 %v4603_v36, %v5465_v38  ;;  %v2368_v18 = vpop.xlane.xlu0 %2367 }
 0x4aa   : > { %4608 = vrcp.f32 %v2368_v18 }
 0x4ab   : > { %v4303_v40 = vpack.c.bf16 %v2588_v42, %v2587_v61  ;;  %4610 = vrcp.f32 %v2386_v21 }
 0x4ac   : > { %v4605_v63 = vpop.eup %4604 }
 0x4ad   : > { %4305 = vmatpush3.bf16.xpose.msk.msra.mxu1 %vm5498_vm5, %v4303_v40  ;;  %v2365_v37 = vpop.xlane.xlu0 %2364  ;;  %v2598_v8 = vmul.f32 %v4605_v63, %v5469_v20 }
 0x4ae   : > { %4612 = vrcp.f32 %v2365_v37  ;;  %4322 = vmatprep.subr.bf16.mxu1 %v5979_v33 }
 0x4af   : > { %v2383_v57 = vpop.xlane.xlu1 %2382 }
 0x4b0   : > { %v4607_v56 = vpop.eup %4606  ;;  %4614 = vrcp.f32 %v2383_v57 }
 0x4b1   : > { %v2597_v15 = vmul.f32 %v4607_v56, %v5489_v16  ;;  %v2374_v38 = vpop.xlane.xlu0 %2373  ;;  %4616 = vrcp.f32 %v2392_v1 }
 0x4b2   : > { %4618 = vrcp.f32 %v2374_v38 }
 0x4b3   : > { %v2371_v21 = vpop.xlane.xlu1 %2370  ;;  %v4323_v22 = vpack.c.bf16 %v2598_v8, %v2597_v15 }
 0x4b4   : > { %4620 = vrcp.f32 %v2371_v21  ;;  %4142 = vmatmul.mubr.msk.f32.vlgmr.msra.gmra.mrb[44].mxu1 %vm229_vm1, %v544_v3  ;;  %v4609_v20 = vpop.eup %4608 }
 0x4b5   : > { %4325 = vmatpush3.bf16.xpose.msk.msra.mxu1 %vm5498_vm5, %v4323_v22  ;;  %v2380_v29 = vpop.xlane.xlu0 %2379  ;;  %4179 = vmatprep.mubr.msk.f32.mxu1 %vm4662_vm4, %v5985_v2  ;;  %4622 = vrcp.f32 %v5740_v10  ;;  %v4611_v16 = vpop.eup %4610  ;;  %v2600_v11 = vmul.f32 %v4609_v20, %v5509_v47 }
 0x4b6   : > { %4326 = vmatprep.subr.bf16.mxu1 %v5979_v33  ;;  %v2606_v43 = vmul.f32 %v4611_v16, %v6005_v5 }
 0x4b7   : > { %v5781_v6 = vpop.xlane.xlu1 %2418 }
 0x4b8   : > { %v4613_v1 = vpop.eup %4612 }
 0x4b9   : > { %v2599_v0 = vmul.f32 %v4613_v1, %v5524_v9  ;;  %v2377_v60 = vpop.xlane.xlu0 %2376 }
 0x4ba   : > { %v4615_v35 = vpop.eup %4614  ;;  %4624 = vrcp.f32 %v2377_v60 }
 0x4bb   : > { %4626 = vrcp.f32 %v2398_v51  ;;  %v2605_v23 = vmul.f32 %v4615_v35, %v5527_v32  ;;  %v350_v31 = vpop.permute.xlu1 %349  ;;  %v4327_v10 = vpack.c.bf16 %v2600_v11, %v2599_v0  ;;  %v4617_v24 = vpop.eup %4616 }
 0x4bc   : > { %4628 = vrcp.f32 %v2380_v29  ;;  %v511_v14 = vadd.f32 %v6006_v54, %v350_v31  ;;  %v4619_v34 = vpop.eup %4618  ;;  %v2608_v55 = vmul.f32 %v4617_v24, %v6007_v46 }
 0x4bd   : > { %4329 = vmatpush3.bf16.xpose.msk.msra.mxu1 %vm5498_vm5, %v4327_v10  ;;  %v2410_v47 = vpop.xlane.xlu0 %2409  ;;  %v4339_v9 = vpack.c.bf16 %v2606_v43, %v2605_v23  ;;  %4630 = vrcp.f32 %v5752_v49  ;;  %v2602_v19 = vmul.f32 %v4619_v34, %v5536_v12 }
 0x4be   : > { %v4621_v26 = vpop.eup %4620  ;;  %4161 = vmatmul.mubr.msk.f32.vlgmr.msra.gmra.mrb[38].mxu0 %vm229_vm1, %v511_v14  ;;  %4330 = vmatprep.subr.bf16.mxu1 %v5979_v33 }
 0x4bf   : > { %v2601_v32 = vmul.f32 %v4621_v26, %v5543_v62  ;;  %4341 = vmatpush3.bf16.xpose.msk.msra.mxu0 %vm5498_vm5, %v4339_v9  ;;  %4198 = vmatprep.mubr.msk.f32.mxu0 %vm4662_vm4, %v5985_v2  ;;  %v4623_v51 = vpop.eup %4622 }
 0x4c0   : > { %4342 = vmatprep.subr.bf16.mxu0 %v5979_v33  ;;  %v2607_v39 = vmul.f32 %v4623_v51, %v6008_v7 }
 0x4c1   : > { %v2407_v49 = vpop.xlane.xlu0 %2406  ;;  %v4331_v58 = vpack.c.bf16 %v2602_v19, %v2601_v32 }
 0x4c2   : > { %4632 = vrcp.f32 %v2407_v49  ;;  %v4343_v61 = vpack.c.bf16 %v2608_v55, %v2607_v39 }
 0x4c3   : > { %4634 = vrcp.f32 %v2410_v47 }
 0x4c4   : > { %v4625_v36 = vpop.eup %4624 }
 0x4c5   : > { %v4627_v62 = vpop.eup %4626  ;;  %4333 = vmatpush3.bf16.xpose.msk.msra.mxu1 %vm5498_vm5, %v4331_v58  ;;  %v2416_v42 = vpop.xlane.xlu0 %2415  ;;  %v2603_v40 = vmul.f32 %v4625_v36, %v5566_v53 }
 0x4c6   : > { %v4629_v18 = vpop.eup %4628  ;;  %4334 = vmatprep.subr.bf16.mxu1 %v5979_v33  ;;  %v2610_v37 = vmul.f32 %v4627_v62, %v5453_v41 }
 0x4c7   : > { %4345 = vmatpush3.bf16.xpose.msk.msra.mxu0 %vm5498_vm5, %v4343_v61  ;;  %v4631_v12 = vpop.eup %4630  ;;  %v2604_v63 = vmul.f32 %v4629_v18, %v5555_v52  ;;  %v545_v52 = vcombine.high %v511_v14, %v511_v14 }
 0x4c8   : > { %4346 = vmatprep.subr.bf16.mxu0 %v5979_v33  ;;  %v2609_v56 = vmul.f32 %v4631_v12, %v5445_v28 }
 0x4c9   : > { %v2413_v57 = vpop.xlane.xlu0 %2412  ;;  %v4335_v8 = vpack.c.bf16 %v2604_v63, %v2603_v40  ;;  %v3391_v63 = vld [vmem:[%s5879_s3 + $0x10] sm:$0xff] }
 0x4ca   : > { %4636 = vrcp.f32 %v2413_v57  ;;  %v4347_v38 = vpack.c.bf16 %v2610_v37, %v2609_v56  ;;  %v3390_v37 = vld [vmem:[%s5879_s3 + $0x8] sm:$0xff]  ;;  %v3392_v57 = vld [vmem:[%s5879_s3 + $0x18] sm:$0xff]  ;;  %v3400_v56 = vpop.permute.xlu1 %3399 }
 0x4cb   : > { %4638 = vrcp.f32 %v2416_v42 }
 0x4cc   : > { %v4633_v15 = vpop.eup %4632 }
 0x4cd   : > { %4337 = vmatpush3.bf16.xpose.msk.msra.mxu1 %vm5498_vm5, %v4335_v8  ;;  %v2422_v53 = vpop.xlane.xlu0 %2421  ;;  %v4635_v3 = vpop.eup %4634  ;;  %v2613_v21 = vmul.f32 %v4633_v15, %v5581_v50 }
 0x4ce   : > { %4354 = vmatprep.subr.bf16.mxu1 %v5979_v33  ;;  %v2614_v28 = vmul.f32 %v4635_v3, %v5577_v27  ;;  %4640 = vrcp.f32 %v2422_v53  ;;  %v3405_v8 = vpop.permute.xlu1 %3404 }
 0x4cf   : > { %4349 = vmatpush3.bf16.xpose.msk.msra.mxu0 %vm5498_vm5, %v4347_v38  ;;  %4642 = vrcp.f32 %v5781_v6 }
 0x4d0   : > { %4350 = vmatprep.subr.bf16.mxu0 %v5979_v33  ;;  %v4355_v22 = vpack.c.bf16 %v2614_v28, %v2613_v21 }
 0x4d1   : > { %v2401_v41 = vpop.xlane.xlu0 %2400 }
 0x4d2   : > { %4644 = vrcp.f32 %v2401_v41  ;;  %v3410_v15 = vpop.permute.xlu1 %3409 }
 0x4d4   : > { %v4637_v29 = vpop.eup %4636  ;;  %4180 = vmatmul.mubr.msk.f32.vlgmr.msra.gmra.mrb[46].mxu1 %vm229_vm1, %v545_v52 }
 0x4d5   : > { %4357 = vmatpush3.bf16.xpose.msk.msra.mxu1 %vm5498_vm5, %v4355_v22  ;;  %v2404_v50 = vpop.xlane.xlu0 %2403  ;;  %4217 = vmatprep.mubr.msk.f32.mxu1 %vm4662_vm4, %v5985_v2  ;;  %v4639_v20 = vpop.eup %4638  ;;  %v2615_v27 = vmul.f32 %v4637_v29, %v5596_v30 }
 0x4d6   : > { %4646 = vrcp.f32 %v2404_v50  ;;  %4358 = vmatprep.subr.bf16.mxu1 %v5979_v33  ;;  %v2616_v16 = vmul.f32 %v4639_v20, %v5590_v4  ;;  %v3415_v28 = vpop.permute.xlu1 %3414 }
 0x4d8   : > { %v4359_v1 = vpack.c.bf16 %v2616_v16, %v2615_v27  ;;  %v4641_v11 = vpop.eup %4640 }
 0x4d9   : > { %v2428_v6 = vpop.xlane.xlu0 %2427  ;;  %v4643_v0 = vpop.eup %4642  ;;  %v2618_v2 = vmul.f32 %v4641_v11, %v5607_v25 }
 0x4da   : > { %4648 = vrcp.f32 %v2428_v6  ;;  %v2617_v30 = vmul.f32 %v4643_v0, %v5560_v13 }
 0x4dc   : > { %v4645_v35 = vpop.eup %4644  ;;  %v4363_v31 = vpack.c.bf16 %v2618_v2, %v2617_v30 }
 0x4dd   : > { %4361 = vmatpush3.bf16.xpose.msk.msra.mxu1 %vm5498_vm5, %v4359_v1  ;;  %v2425_v60 = vpop.xlane.xlu0 %2424  ;;  %v2611_v4 = vmul.f32 %v4645_v35, %v5618_v44  ;;  %v6009_v44 = vld [vmem:[#allocation4_spill] sm:$0xff] }
 0x4de   : > { %4650 = vrcp.f32 %v2425_v60  ;;  %4362 = vmatprep.subr.bf16.mxu1 %v5979_v33 }
 0x4e0   : > { %v4647_v5 = vpop.eup %4646 }
 0x4e1   : > { %v2612_v43 = vmul.f32 %v4647_v5, %v5625_v17 }
 0x4e3   : > { %v4351_v23 = vpack.c.bf16 %v2612_v43, %v2611_v4 }
 0x4e4   : > { %v4649_v10 = vpop.eup %4648 }
 0x4e5   : > { %4353 = vmatpush3.bf16.xpose.msk.msra.mxu0 %vm5498_vm5, %v4351_v23  ;;  %4365 = vmatpush3.bf16.xpose.msk.msra.mxu1 %vm5498_vm5, %v4363_v31  ;;  %v355_v24 = vpop.permute.xlu0 %354  ;;  %v2620_v54 = vmul.f32 %v4649_v10, %v5634_v59 }
 0x4e6   : > { %4366 = vmatprep.subr.bf16.mxu1 %v5979_v33  ;;  %v516_v14 = vadd.f32 %v6009_v44, %v355_v24  ;;  %v3389_v33 = vld [vmem:[%s5879_s3] sm:$0xff] }
 0x4e8   : > { %v4651_v25 = vpop.eup %4650  ;;  %v546_v34 = vcombine.high %v516_v14, %v516_v14 }
 0x4e9   : > { %v2619_v13 = vmul.f32 %v4651_v25, %v5641_v45 }
 0x4eb   : > { %v4367_v17 = vpack.c.bf16 %v2620_v54, %v2619_v13 }
 0x4ec   : > { %4199 = vmatmul.mubr.msk.f32.vlgmr.msra.gmra.mrb[40].mxu0 %vm229_vm1, %v516_v14 }
 0x4ed   : > { %4369 = vmatpush3.bf16.xpose.msk.msra.mxu1 %vm5498_vm5, %v4367_v17  ;;  %4228 = vmatprep.mubr.msk.f32.mxu0 %vm357_vm0, %v3389_v33 }
 0x4f4   : > { %4218 = vmatmul.mubr.msk.f32.vlgmr.msra.gmra.mrb[48].mxu1 %vm229_vm1, %v546_v34 }
 0x52c   : > { %v2713_v47 = vpop.f32.mrb[34].mxu0 }
 0x52d   : > { %v4086_v9 = vpop.f32.mrb[35].mxu0 }
 0x54f   : > { %v2809_v59 = vpop.f32.mrb[42].mxu1 }
 0x550   : > { %v3425_v45 = vcombine.low %v2713_v47, %v2809_v59  ;;  %v4105_v26 = vpop.f32.mrb[43].mxu1 }
 0x557   : > { %v2905_v32 = vpop.f32.mrb[36].mxu0 }
 0x558   : > { %v4124_v51 = vpop.f32.mrb[37].mxu0 }
 0x587   : > { %v3001_v46 = vpop.f32.mrb[44].mxu1 }
 0x588   : > { %v3426_v55 = vcombine.low %v2905_v32, %v3001_v46  ;;  %v4143_v48 = vpop.f32.mrb[45].mxu1 }
 0x58a   : > { %v4370_v19 = vpack.c.bf16 %v3426_v55, %v3425_v45 }
 0x58c   : > { %4371 = vmatprep.subr.bf16.mxu0 %v4370_v19 }
 0x58d   : > { %4373 = vmatpush3.bf16.msra.mxu0 %v4370_v19 }
 0x591   : > { %v3097_v49 = vpop.f32.mrb[38].mxu0 }
 0x592   : > { %v4162_v7 = vpop.f32.mrb[39].mxu0 }
 0x5a7   : > { %v3193_v39 = vpop.f32.mrb[46].mxu1 }
 0x5a8   : > { %v3427_v58 = vcombine.low %v3097_v49, %v3193_v39  ;;  %v4181_v36 = vpop.f32.mrb[47].mxu1 }
 0x5bf   : > { %v3289_v62 = vpop.f32.mrb[40].mxu0 }
 0x5c0   : > { %v4200_v42 = vpop.f32.mrb[41].mxu0 }
 0x5c7   : > { %v3385_v61 = vpop.f32.mrb[48].mxu1 }
 0x5c8   : > { %v3428_v18 = vcombine.low %v3289_v62, %v3385_v61  ;;  %v4219_v40 = vpop.f32.mrb[49].mxu1 }
 0x5ca   : > { %v4374_v12 = vpack.c.bf16 %v3428_v18, %v3427_v58 }
 0x5cc   : > { %4375 = vmatprep.subr.bf16.mxu0 %v4374_v12 }
 0x5cd   : > { %4377 = vmatpush3.bf16.msra.mxu0 %v4374_v12 }
 0x5d0   : > { %4229 = vmatmul.mubr.msk.f32.vlgmr.msra.gmra.mrb[42].mxu0 %vm357_vm0, %v3390_v37 }
 0x5d1   : > { %4231 = vmatprep.mubr.msk.f32.mxu0 %vm357_vm0, %v3391_v63 }
 0x5d4   : > { %4232 = vmatmul.mubr.msk.f32.gmra.mrb[44].mxu0 %vm357_vm0, %v3392_v57 }
 0x6a3   : > { %v4230_v53 = vpop.f32.mrb[42].mxu0 }
 0x6a4   : > { %v3517_v38 = vadd.f32 %v4230_v53, %v3405_v8  ;;  %v3511_v3 = vpop.f32.mrb[43].mxu0 }
 0x6a5   : > { %v3512_v21 = vadd.f32 %v3511_v3, %v3400_v56 }
 0x6a6   : > { %3531 = vst.msk [vmem:[%s224_s23 + $0x8] sm:$0xff] %vm229_vm1, %v3517_v38 }
 0x6a7   : > { %3530 = vst.msk [vmem:[%s224_s23] sm:$0xff] %vm229_vm1, %v3512_v21  ;;  %v4233_v41 = vpop.f32.mrb[44].mxu0 }
 0x6a8   : > { %v3527_v52 = vadd.f32 %v4233_v41, %v3415_v28  ;;  %v3521_v22 = vpop.f32.mrb[45].mxu0 }
 0x6a9   : > { %v3522_v29 = vadd.f32 %v3521_v22, %v3410_v15 }
 0x6aa   : > { %3533 = vst.msk [vmem:[%s224_s23 + $0x18] sm:$0xff] %vm229_vm1, %v3527_v52 }
 0x6ab   : > { %3532 = vst.msk [vmem:[%s224_s23 + $0x10] sm:$0xff] %vm229_vm1, %v3522_v29 }
 0x6ac PF: > { %s15_s18 = sadd.s32 1, %s4658_s18  }
 0x6ad   : > { %p12_p4 = scmp.ge.s32.totalorder %s15_s18, 4  }
 0x6af   :  { %14 = sbr.rel (!%p12_p4) target bundleno = 1 (0x1), region = 70 }

</bundles_post_ra>
